<compile_context>
chip_gen: v7x
topology: tpu7x:2x2x1
jax: 0.10.0
libtpu: 0.0.40
codegen_flags: <defaults>
</compile_context>

<pallas_src>
import math
import functools

import jax
import jax.numpy as jnp
from jax.experimental import pallas as pl
from jax.experimental.pallas import tpu as pltpu

NEG_INF = -0.7 * float(jnp.finfo(jnp.float32).max)   # large-negative mask value (avoids inf-inf NaNs)
_VMEM_LIMIT = 32 * 1024 * 1024                       # safe on v5e/v6e/v7x scoped-VMEM budgets
_STAT_LANES = 128                                    # lane-replicated width for m/l running stats


def _tile(dim, candidates):
    """Largest candidate tile dividing `dim`, else the full dim (satisfies the
    (8,128)-or-full-dim rule since candidates are multiples of 8/128)."""
    for c in candidates:
        if dim % c == 0:
            return c
    return dim


# ------------------------- tiled projection matmul (y = x @ w) -------------------------

def _matmul_kernel(x_ref, w_ref, o_ref, acc_ref):
    @pl.when(pl.program_id(2) == 0)
    def _():
        acc_ref[...] = jnp.zeros_like(acc_ref)

    acc_ref[...] += jnp.dot(x_ref[...], w_ref[...],
                            preferred_element_type=jnp.float32)

    @pl.when(pl.program_id(2) == pl.num_programs(2) - 1)
    def _():
        o_ref[...] = acc_ref[...].astype(o_ref.dtype)


def matmul(x2d, w):
    """x2d: (M, K), w: (K, N) -> (M, N).  Weights pre-transposed in the wrapper so the
    kernel is a plain (M,K)x(K,N) MXU dot with a lane-dense output tile."""
    M, K = x2d.shape
    K2, N = w.shape
    assert K == K2
    tm = _tile(M, (512, 256, 128, 64, 32, 16, 8))
    tn = _tile(N, (512, 256, 128))
    tk = _tile(K, (1024, 512, 256, 128))
    grid = (M // tm, N // tn, K // tk)
    return pl.pallas_call(
        _matmul_kernel,
        out_shape=jax.ShapeDtypeStruct((M, N), x2d.dtype),
        grid=grid,
        in_specs=[
            pl.BlockSpec((tm, tk), lambda i, j, k: (i, k)),
            pl.BlockSpec((tk, tn), lambda i, j, k: (k, j)),
        ],
        out_specs=pl.BlockSpec((tm, tn), lambda i, j, k: (i, j)),
        scratch_shapes=[pltpu.VMEM((tm, tn), jnp.float32)],
        compiler_params=pltpu.CompilerParams(
            dimension_semantics=("parallel", "parallel", "arbitrary"),
            vmem_limit_bytes=_VMEM_LIMIT),
    )(x2d, w)


# ---------------------- K pre-rotation pass (RoPE, roll form, once) ---------------------

def _rope_k_kernel(k_ref, c_ref, s_ref, o_ref, *, hd2):
    k = k_ref[0].astype(jnp.float32)                                       # (ts, hd)
    rot = k * c_ref[...] + pltpu.roll(k, hd2, axis=1) * s_ref[...]
    o_ref[0] = rot.astype(o_ref.dtype)


# ------------------------------- flash attention kernel --------------------------------

def _flash_attn_kernel(q_ref, k_ref, v_ref, cq_ref, sq_ref,
                       o_ref, qrot_scr, m_scr, l_scr, acc_scr,
                       *, hd, tq, tk, causal, approx_recip):
    qi = pl.program_id(2)
    kj = pl.program_id(3)
    hd2 = hd // 2

    @pl.when(kj == 0)
    def _():
        m_scr[...] = jnp.full_like(m_scr, NEG_INF)
        l_scr[...] = jnp.zeros_like(l_scr)
        acc_scr[...] = jnp.zeros_like(acc_scr)
        # Q rotary hoisted out of the kv loop: f32 roll-form rotation, once per q tile.
        q = q_ref[0].astype(jnp.float32)                                   # (tq, hd)
        q_rot = q * cq_ref[...] + pltpu.roll(q, hd2, axis=1) * sq_ref[...]
        qrot_scr[...] = q_rot.astype(qrot_scr.dtype)

    def compute(masked):
        k = k_ref[0]                                                       # (tk, hd) pre-rotated
        v = v_ref[0]                                                       # (tk, hd)
        s = jax.lax.dot_general(qrot_scr[...], k, (((1,), (1,)), ((), ())),
                                preferred_element_type=jnp.float32)        # (tq, tk)
        if masked:
            row = qi * tq + jax.lax.broadcasted_iota(jnp.int32, (tq, tk), 0)
            col = kj * tk + jax.lax.broadcasted_iota(jnp.int32, (tq, tk), 1)
            s = jnp.where(row >= col, s, NEG_INF)

        # Online softmax update (f32, lane-replicated running stats).
        m_prev = m_scr[...]                                                # (tq, 128)
        l_prev = l_scr[...]                                                # (tq, 128)
        m_curr = jnp.max(s, axis=-1, keepdims=True)                        # (tq, 1)
        m_next = jnp.maximum(m_prev, m_curr)                               # (tq, 128)
        alpha = jnp.exp(m_prev - m_next)                                   # (tq, 128)
        p = jnp.exp(s - m_next[:, :1])                                     # (tq, tk)
        l_scr[...] = alpha * l_prev + jnp.sum(p, axis=-1, keepdims=True)
        m_scr[...] = m_next
        pv = jnp.dot(p.astype(v.dtype), v, preferred_element_type=jnp.float32)
        a = alpha if hd == _STAT_LANES else alpha[:, :1]
        acc_scr[...] = acc_scr[...] * a + pv

    if causal:
        first_row = qi * tq
        last_row = first_row + tq - 1
        first_col = kj * tk
        last_col = first_col + tk - 1
        run = last_row >= first_col            # tile not fully above the diagonal
        below = first_row >= last_col          # tile fully below the diagonal -> no mask
        pl.when(jnp.logical_and(run, below))(lambda: compute(False))
        pl.when(jnp.logical_and(run, jnp.logical_not(below)))(lambda: compute(True))
    else:
        compute(False)

    @pl.when(kj == pl.num_programs(3) - 1)
    def _():
        l = l_scr[...]
        if approx_recip:
            inv = pl.reciprocal(l, approx=True)                            # EUP, co-issues free
            scale = inv if hd == _STAT_LANES else inv[:, :1]
            o_ref[0] = (acc_scr[...] * scale).astype(o_ref.dtype)
        else:
            lb = l if hd == _STAT_LANES else l[:, :1]
            o_ref[0] = (acc_scr[...] / lb).astype(o_ref.dtype)


# -------------------------------------- wrapper -----------------------------------------

def attention_forward(x, wq, wk, wv, wo, cos, sin, n_heads, n_kv_heads,
                      causal=True, tq=None, tk=None):
    """Equivalent of Attention.forward(x, start_pos=0, freqs_cis, causal mask, adapter=None)."""
    B, S, D = x.shape
    hd = D // n_heads
    hd2 = hd // 2
    assert hd % 128 == 0, "flat-QKV (transpose-free) layout requires head_dim % 128 == 0"
    n_rep = n_heads // n_kv_heads
    Nq = n_heads * hd
    Nkv = n_kv_heads * hd
    Ntot = Nq + 2 * Nkv
    scale = 1.0 / math.sqrt(hd)

    # ---- weight prep (weight-only, constant-foldable; zero activation traffic) ----
    # Permute Wq/Wk output features per head to [even half | odd half] so the projection
    # directly emits the rotary-friendly layout (QK^T is invariant to this permutation),
    # and fold the 1/sqrt(hd) softmax scale into Wq.
    perm = jnp.concatenate([jnp.arange(0, hd, 2), jnp.arange(1, hd, 2)])

    def permute_rows(w, nh):
        idx = (jnp.arange(nh)[:, None] * hd + perm[None, :]).reshape(-1)
        return w[idx, :]

    w_qkv = jnp.concatenate(
        [(permute_rows(wq, n_heads) * scale).T, permute_rows(wk, n_kv_heads).T, wv.T],
        axis=1)                                                            # (D, Ntot)
    wo_t = wo.T

    # Full-width rotary tables for the roll form: [c|c] and [-s|s].
    cos_cat = jnp.concatenate([cos, cos], axis=-1).astype(jnp.float32)     # (S, hd)
    sin_sgn = jnp.concatenate([-sin, sin], axis=-1).astype(jnp.float32)    # (S, hd)

    # ---- fused QKV projection (x read from HBM once); stays flat, no transposes ----
    qkv = matmul(x.reshape(B * S, D), w_qkv).reshape(B, S, Ntot)

    # ---- pre-rotate K once (reads K columns straight out of qkv via index_map) ----
    ts = _tile(S, (512, 256, 128, 64, 32, 16, 8))
    k_rot = pl.pallas_call(
        functools.partial(_rope_k_kernel, hd2=hd2),
        out_shape=jax.ShapeDtypeStruct((B, S, Nkv), x.dtype),
        grid=(B, n_kv_heads, S // ts),
        in_specs=[
            pl.BlockSpec((1, ts, hd), lambda b, h, i: (b, i, n_heads + h)),
            pl.BlockSpec((ts, hd), lambda b, h, i: (i, 0)),
            pl.BlockSpec((ts, hd), lambda b, h, i: (i, 0)),
        ],
        out_specs=pl.BlockSpec((1, ts, hd), lambda b, h, i: (b, i, h)),
        compiler_params=pltpu.CompilerParams(
            dimension_semantics=("parallel", "parallel", "parallel"),
            vmem_limit_bytes=_VMEM_LIMIT),
    )(qkv, cos_cat, sin_sgn)

    # ---- flash attention (GQA via index_map; Q/V read directly from flat qkv) ----
    if tq is None:
        tq = _tile(S, (512, 256, 128, 64, 32, 16, 8))
    if tk is None:
        tk = _tile(S, (1024, 512, 256, 128, 64, 32, 16, 8))
    assert S % tq == 0 and S % tk == 0
    grid = (B, n_heads, S // tq, S // tk)
    approx_recip = jnp.dtype(x.dtype) != jnp.dtype(jnp.float32)
    kernel = functools.partial(_flash_attn_kernel, hd=hd, tq=tq, tk=tk,
                               causal=causal, approx_recip=bool(approx_recip))

    out = pl.pallas_call(
        kernel,
        out_shape=jax.ShapeDtypeStruct((B, S, Nq), x.dtype),
        grid=grid,
        in_specs=[
            pl.BlockSpec((1, tq, hd), lambda b, h, i, j: (b, i, h)),                 # Q columns of qkv
            pl.BlockSpec((1, tk, hd), lambda b, h, i, j: (b, j, h // n_rep)),        # pre-rotated K (GQA)
            pl.BlockSpec((1, tk, hd),                                                # V columns of qkv (GQA)
                         lambda b, h, i, j: (b, j, n_heads + n_kv_heads + h // n_rep)),
            pl.BlockSpec((tq, hd), lambda b, h, i, j: (i, 0)),                       # cos ([c|c]) for q rows
            pl.BlockSpec((tq, hd), lambda b, h, i, j: (i, 0)),                       # sin ([-s|s]) for q rows
        ],
        out_specs=pl.BlockSpec((1, tq, hd), lambda b, h, i, j: (b, i, h)),
        scratch_shapes=[
            pltpu.VMEM((tq, hd), x.dtype),               # q_rot (hoisted per q tile)
            pltpu.VMEM((tq, _STAT_LANES), jnp.float32),  # m (running max, lane-replicated)
            pltpu.VMEM((tq, _STAT_LANES), jnp.float32),  # l (running sum, lane-replicated)
            pltpu.VMEM((tq, hd), jnp.float32),           # acc
        ],
        compiler_params=pltpu.CompilerParams(
            dimension_semantics=("parallel", "parallel", "parallel", "arbitrary"),
            vmem_limit_bytes=_VMEM_LIMIT),
    )(qkv, k_rot, qkv, cos_cat, sin_sgn)

    # ---- output projection (reshape is free: layout already (B, S, Nq)) ----
    y = matmul(out.reshape(B * S, Nq), wo_t).reshape(B, S, D)
    return y


# ---------------------------------- rotary tables ---------------------------------------

def precompute_cos_sin(head_dim, seqlen, theta=500000.0):
    # Matches precompute_freqs_cis (start_pos = 0): angle[t, j] = t * theta^(-2j/hd)
    freqs = 1.0 / (theta ** (jnp.arange(0, head_dim, 2, dtype=jnp.float32) / head_dim))
    t = jnp.arange(seqlen, dtype=jnp.float32)
    ang = jnp.outer(t, freqs)                                              # (S, hd/2)
    return jnp.cos(ang), jnp.sin(ang)


# -------------------------------- pure-JAX reference ------------------------------------

def reference(x, wq, wk, wv, wo, cos, sin, mask, n_heads, n_kv_heads):
    B, S, D = x.shape
    hd = D // n_heads
    n_rep = n_heads // n_kv_heads
    xq = (x @ wq.T).reshape(B, S, n_heads, hd)
    xk = (x @ wk.T).reshape(B, S, n_kv_heads, hd)
    xv = (x @ wv.T).reshape(B, S, n_kv_heads, hd)

    def rot(t):
        te, to = t[..., 0::2], t[..., 1::2]
        c = cos[None, :, None, :]
        s = sin[None, :, None, :]
        re = te * c - to * s
        ro = te * s + to * c
        return jnp.stack([re, ro], axis=-1).reshape(t.shape)

    xq, xk = rot(xq), rot(xk)
    keys = jnp.repeat(xk, n_rep, axis=2)     # repeat_interleave over heads
    values = jnp.repeat(xv, n_rep, axis=2)
    qh = jnp.transpose(xq, (0, 2, 1, 3))
    kh = jnp.transpose(keys, (0, 2, 1, 3))
    vh = jnp.transpose(values, (0, 2, 1, 3))
    scores = jnp.einsum('bhqd,bhkd->bhqk', qh, kh) / math.sqrt(hd)
    scores = scores + mask[None, None]
    scores = jax.nn.softmax(scores.astype(jnp.float32), axis=-1)
    out = jnp.einsum('bhqk,bhkd->bhqd', scores, vh)
    out = jnp.transpose(out, (0, 2, 1, 3)).reshape(B, S, -1)
    return out @ wo.T


# --------------------------------------- main -------------------------------------------

if __name__ == "__main__":
    # Small config with llama3-style head_dim=128: dim=512, n_heads=4, n_kv_heads=2
    # (n_rep=2), B=2, S=32.  tq=tk=8 overrides force a 4x4 kv/q tile grid so the
    # multi-tile online softmax, causal skip, masked and unmasked branches all execute.
    B, S = 2, 32
    n_heads, n_kv_heads = 4, 2
    hd = 128
    D = n_heads * hd

    key = jax.random.PRNGKey(0)
    k1, k2, k3, k4, k5 = jax.random.split(key, 5)
    x = jax.random.normal(k1, (B, S, D), jnp.float32)
    wq = jax.random.normal(k2, (n_heads * hd, D), jnp.float32) * 0.05
    wk = jax.random.normal(k3, (n_kv_heads * hd, D), jnp.float32) * 0.05
    wv = jax.random.normal(k4, (n_kv_heads * hd, D), jnp.float32) * 0.05
    wo = jax.random.normal(k5, (D, n_heads * hd), jnp.float32) * 0.05

    cos, sin = precompute_cos_sin(hd, S, theta=500000.0)

    y = attention_forward(x, wq, wk, wv, wo, cos, sin, n_heads, n_kv_heads,
                          causal=True, tq=8, tk=8)
    jax.block_until_ready(y)

    # Reference uses an explicit causal mask (start_pos = 0); kernel builds it in-kernel.
    mask = jnp.triu(jnp.full((S, S), -jnp.inf, dtype=jnp.float32), k=1)
    y_ref = reference(x, wq, wk, wv, wo, cos, sin, mask, n_heads, n_kv_heads)
    assert y.shape == (B, S, D)
    assert jnp.allclose(y, y_ref, atol=2e-3, rtol=2e-3), "mismatch vs pure-JAX reference"

    print("KERNEL_OK")
</pallas_src>

<mosaic_0001>
module attributes {stable_mosaic.version = 11 : i64} {
  func.func @_matmul_kernel(%arg0: i32, %arg1: i32, %arg2: i32, %arg3: memref<64x512xf32, #tpu.memory_space<vmem>>, %arg4: memref<512x512xf32, #tpu.memory_space<vmem>>, %arg5: memref<64x512xf32, #tpu.memory_space<vmem>>, %arg6: memref<64x512xf32, #tpu.memory_space<vmem>>) attributes {dimension_semantics = [#tpu.dimension_semantics<parallel>, #tpu.dimension_semantics<parallel>, #tpu.dimension_semantics<arbitrary>], iteration_bounds = array<i64: 1, 2, 1>, scalar_prefetch = 0 : i64, scratch_operands = 1 : i64, tpu.core_type = #tpu.core_type<tc>, window_params = [{transform_indices = @transform_0, window_bounds = array<i64: 64, 512>}, {transform_indices = @transform_1, window_bounds = array<i64: 512, 512>}, {transform_indices = @transform_2, window_bounds = array<i64: 64, 512>}]} {
    %c0_i32 = arith.constant 0 : i32
    %0 = arith.cmpi eq, %arg2, %c0_i32 : i32
    %1 = arith.extui %0 : i1 to i32
    %c0_i32_0 = arith.constant 0 : i32
    %2 = arith.cmpi ne, %1, %c0_i32_0 : i32
    scf.if %2 {
      %cst_10 = arith.constant 0.000000e+00 : f32
      %12 = vector.broadcast %cst_10 : f32 to vector<64x512xf32>
      %c0_11 = arith.constant 0 : index
      %c0_12 = arith.constant 0 : index
      %13 = vector.load %arg6[%c0_11, %c0_12] : memref<64x512xf32, #tpu.memory_space<vmem>>, vector<64x512xf32>
      tpu.vector_store %arg6[%c0_11, %c0_12], %12 {strides = array<i32>} : memref<64x512xf32, #tpu.memory_space<vmem>>, vector<64x512xf32>,
    } else {
    }
    %c0 = arith.constant 0 : index
    %c0_1 = arith.constant 0 : index
    %3 = vector.load %arg6[%c0, %c0_1] : memref<64x512xf32, #tpu.memory_space<vmem>>, vector<64x512xf32>
    %c0_2 = arith.constant 0 : index
    %c0_3 = arith.constant 0 : index
    %4 = vector.load %arg3[%c0_2, %c0_3] : memref<64x512xf32, #tpu.memory_space<vmem>>, vector<64x512xf32>
    %c0_4 = arith.constant 0 : index
    %c0_5 = arith.constant 0 : index
    %5 = vector.load %arg4[%c0_4, %c0_5] : memref<512x512xf32, #tpu.memory_space<vmem>>, vector<512x512xf32>
    %cst = arith.constant dense<0.000000e+00> : vector<64x512xf32>
    %6 = tpu.matmul %4, %5, %cst {dimension_numbers = #tpu.dot_dimension_numbers<[1], [0], [0], [1], [0, 0, 1, 1], [], []>} : vector<64x512xf32>, vector<512x512xf32>, vector<64x512xf32> -> vector<64x512xf32>
    %7 = arith.addf %3, %6 : vector<64x512xf32>
    %c0_6 = arith.constant 0 : index
    %c0_7 = arith.constant 0 : index
    %8 = vector.load %arg6[%c0_6, %c0_7] : memref<64x512xf32, #tpu.memory_space<vmem>>, vector<64x512xf32>
    tpu.vector_store %arg6[%c0_6, %c0_7], %7 {strides = array<i32>} : memref<64x512xf32, #tpu.memory_space<vmem>>, vector<64x512xf32>,
    %c0_i32_8 = arith.constant 0 : i32
    %9 = arith.cmpi eq, %arg2, %c0_i32_8 : i32
    %10 = arith.extui %9 : i1 to i32
    %c0_i32_9 = arith.constant 0 : i32
    %11 = arith.cmpi ne, %10, %c0_i32_9 : i32
    scf.if %11 {
      %c0_10 = arith.constant 0 : index
      %c0_11 = arith.constant 0 : index
      %12 = vector.load %arg6[%c0_10, %c0_11] : memref<64x512xf32, #tpu.memory_space<vmem>>, vector<64x512xf32>
      %c0_12 = arith.constant 0 : index
      %c0_13 = arith.constant 0 : index
      %13 = vector.load %arg5[%c0_12, %c0_13] : memref<64x512xf32, #tpu.memory_space<vmem>>, vector<64x512xf32>
      tpu.vector_store %arg5[%c0_12, %c0_13], %12 {strides = array<i32>} : memref<64x512xf32, #tpu.memory_space<vmem>>, vector<64x512xf32>,
    } else {
    }
    return
  }
  func.func @transform_0(%arg0: i32, %arg1: i32, %arg2: i32) -> (i32, i32) {
    %c0_i32 = arith.constant 0 : i32
    return %arg0, %arg2 : i32, i32
  }
  func.func @transform_1(%arg0: i32, %arg1: i32, %arg2: i32) -> (i32, i32) {
    %c0_i32 = arith.constant 0 : i32
    return %arg2, %arg1 : i32, i32
  }
  func.func @transform_2(%arg0: i32, %arg1: i32, %arg2: i32) -> (i32, i32) {
    %c0_i32 = arith.constant 0 : i32
    return %arg0, %arg1 : i32, i32
  }
}

</mosaic_0001>

<bundles_post_ra>
// kernel: tpu_custom_call.1
= control target key start
LH: loop header
LB: loop body
LE: loop exit
PB: predicated region body
PF: predicated region fallthrough
CT: control target
= control target key end

     0   :  { %7 = vsyncpa [#allocation4], 0  ;;  %s2360_s0 = inlined_call_operand.hbm [shape: f32[64,512], index: 0, kind: input, shape index: {}]   ;;  %s2361_s1 = inlined_call_operand.hbm [shape: f32[512,1024], index: 1, kind: input, shape index: {}]   ;;  %s2362_s2 = inlined_call_operand.hbm [shape: f32[64,1024], index: 2, kind: output, shape index: {}]  }
   0x1   :  { %8 = vsyncpa [#allocation7], 0 }
   0x2   :  { %10 = vsyncpa [#allocation7 + $0x1], 0 }
   0x3   :  { %11 = vsyncpa [#allocation5], 0 }
   0x4   :  { %13 = vsyncpa [#allocation5 + $0x1], 0  ;;  %s1841_s9 = smov 0   ;;  %s1843_s10 = smov 0  }
   0x5   :  { %s1845_s11 = smov 0   ;;  %s1847_s12 = smov 0  }
   0x6   :  { %s1849_s13 = smov 0   ;;  %s1851_s14 = smov 0  }
   0x7 LB: > { %s1285_s15 = sadd.s32 4294967295, %s1815_s14   ;;  %s1286_s16 = sadd.s32 4294967294, %s1815_s14   ;;  %s1815_s14 = sphi %s1851_s14, %s19_s14   ;;  %s1811_s13 = sphi %s1849_s13, %s2388_s13   ;;  %s1807_s12 = sphi %s1847_s12, %s2387_s12   ;;  %s1803_s11 = sphi %s1845_s11, %s2386_s11   ;;  %s1799_s10 = sphi %s1843_s10, %s2385_s10   ;;  %s1795_s9 = sphi %s1841_s9, %s2384_s9  }
   0x8   : > { %p82_p0 = scmp.ne.s32.totalorder %s1803_s11, %s1799_s10  ;;  %p83_p1 = scmp.eq.s32.totalorder %s1815_s14, 0 }
   0x9   : > { %p88_p2 = scmp.ne.s32.totalorder %s1799_s10, %s1795_s9  ;;  %p1878_p3 = scmp.eq.s32.totalorder %s1285_s15, 0 }
   0xa   : > { %p1882_p4 = por %p83_p1, %p82_p0  ;;  %p114_p5 = scmp.eq.s32.totalorder %s1285_s15, 1 }
   0xb   : > { %s2369_s17 = scalar_select %p1878_p3, 1, 0 }
   0xc   : > { %p1888_p6 = por %p1878_p3, %p88_p2  ;;  %p120_p7 = scmp.eq.s32.totalorder %s1286_s16, 1 }
   0xd   : > { %p1892_p8 = por %p114_p5, %p82_p0  ;;  %p1287_p9 = scmp.ge.s32.totalorder %s1815_s14, 1 }
   0xe   : > { %s2371_s19 = scalar_select %p1888_p6, 1, 0 }
   0xf   : > { %s2372_s20 = scalar_select %p1892_p8, 1, 0 }
  0x10   : > { %p1897_p10 = por %p120_p7, %p88_p2  ;;  %p127_p11 = scmp.lt.s32.totalorder %s1815_s14, 3 }
  0x11   : > { %s1817_s23 = smov [#allocation3]   ;;  %p1613_p1 = scmp.lt.s32.totalorder %s1815_s14, 2 }
  0x12   : > { %s2373_s21 = scalar_select %p1897_p10, 1, 0 }
  0x13   : > { %p1902_p12 = pnand %p1287_p9, %p127_p11  ;;  %s145_s24 = sshll.u32 %s1817_s23, 4  ;;  %s1906_s24 = int_to_ptr.vmem [resolvable:$true] %s145_s24 }
  0x14   : > { %p1920_p2 = pnand %p1613_p1, %p1882_p4  ;;  %s34_s27 = sadd.s32 1, %s1811_s13 }
  0x15   : > { %s2374_s22 = scalar_select %p1902_p12, 1, 0 }
  0x16   : > { %p1600_p13 = pneg %p1902_p12  ;;  %s1671_s30 = scalar_lea.hbm %s2360_s0, 4096 }
  0x17   : > { %s2376_s26 = scalar_select %p1920_p2, 1, 0 }
  0x18   : > { %p1914_p5 = pnand %p1600_p13, %p1878_p3  ;;  %p1672_p7 = scmp.ne.s32.totalorder %s2360_s0, %s1671_s30 }
  0x19   : > { %p1678_p4 = scmp.lt.u32.totalorder %s1671_s30, %s2360_s0 }
  0x1a   : > { %p1673_p9 = pneg %p1914_p5 }
  0x1c   : > { %p1674_p11 = pnand %p1673_p9, %p1672_p7 }
  0x1e   : > { %p1675_p13 = pneg %p1674_p11 }
  0x20   : > { %p1680_p1 = pnand %p1678_p4, %p1675_p13 }
  0x22   : > { %1683 = shalt.err (!%p1680_p1)
}
  0x23   : > { %s1684_s7 = scalar_lea.vmem %s1906_s24, 4096  ;;  %p1692_p6 = scmp.lt.s32.totalorder %s1906_s24, %s1906_s24 }
  0x24   : > { %p1685_p0 = scmp.ne.s32.totalorder %s1906_s24, %s1684_s7  ;;  %p1693_p3 = scmp.lt.s32.totalorder %s1684_s7, %s1684_s7 }
  0x26   : > { %p1687_p10 = pnand %p1685_p0, %p1673_p9  ;;  %p1694_p12 = por %p1693_p3, %p1692_p6 }
  0x28   : > { %p1688_p8 = pneg %p1687_p10 }
  0x2a   : > { %p1695_p2 = pnand %p1694_p12, %p1688_p8 }
  0x2c   : > { %1698 = shalt.err (!%p1695_p2)
}
  0x2d   : > { %s1818_s8 = smov 512   ;;  %s1819_s15 = smov 32  }
  0x2e   : > { %1603 = dma.hbm_to_vmem [thread:$0]  (!%p1914_p5), %s2360_s0, 4096, %s1906_s24, [#allocation4], %s1818_s8, %s1818_s8, %s1819_s15  }
  0x2f   : > { %p36_p3 = scmp.ge.s32.totalorder %s34_s27, 2  ;;  %s75_s23 = sadd.s32 1, %s1803_s11 }
  0x30   : > { %s159_s28 = sand.u32 1, %s1803_s11   ;;  %s1302_s3 = sshll.u32 %s1811_s13, 9 }
  0x31   : > { %s2390_s27 = smov (%p36_p3, %s34_s27), 0  ;;  %s1290_s29 = sshll.u32 %s159_s28, 11 }
  0x32   : > { %s71_s30 = ssub.s32 %s1811_s13, %s2390_s27  ;;  %s1959_s5 = scalar_lea.hbm %s2361_s1, %s1302_s3 }
  0x33   : > { %p73_p6 = scmp.eq.s32.totalorder %s71_s30, 0  ;;  %s163_s24 = scalar_lea.vmem [#allocation6], %s1290_s29 }
  0x34   : > { %s173_s6 = sshll.u32 %s163_s24, 4  ;;  %s1966_s16 = scalar_lea.sflag [#allocation7], %s159_s28  ;;  %s1964_s6 = int_to_ptr.vmem [resolvable:$true] %s173_s6 }
  0x35   : > { %s1962_s7 = scalar_select %p73_p6, %s1803_s11, %s75_s23  }
  0x36   : > { %s1699_s18 = scalar_lea.hbm %s1959_s5, 32768  ;;  %p2377_p10 = scmp.ne.s32.totalorder %s2376_s26, 0 }
  0x37   : > { %p1700_p8 = scmp.ne.s32.totalorder %s1959_s5, %s1699_s18  ;;  %s1704_s25 = scalar_lea.hbm %s2361_s1, 65536 }
  0x38   : > { %p1701_p12 = pneg %p2377_p10  ;;  %p1705_p2 = scmp.lt.u32.totalorder %s1959_s5, %s2361_s1 }
  0x39   : > { %p1706_p7 = scmp.lt.u32.totalorder %s1704_s25, %s1699_s18  ;;  %p1708_p11 = scmp.lt.u32.totalorder %s1699_s18, %s1959_s5 }
  0x3a   : > { %p1702_p0 = pnand %p1701_p12, %p1700_p8 }
  0x3b   : > { %p1707_p9 = por %p1706_p7, %p1705_p2 }
  0x3c   : > { %p1703_p5 = pneg %p1702_p0 }
  0x3d   : > { %p1709_p13 = por %p1708_p11, %p1707_p9 }
  0x3f   : > { %p1710_p4 = pnand %p1709_p13, %p1703_p5 }
  0x41   : > { %1713 = shalt.err (!%p1710_p4)
}
  0x42   : > { %s1714_s23 = scalar_lea.vmem %s1964_s6, 32768  ;;  %s1820_s28 = smov [#allocation6]  }
  0x43   : > { %p1715_p1 = scmp.ne.s32.totalorder %s1964_s6, %s1714_s23  ;;  %s1719_s24 = sshll.u32 %s1820_s28, 4  ;;  %s1720_s24 = int_to_ptr.vmem [resolvable:$false] %s1719_s24 }
  0x44   : > { %s1721_s30 = scalar_lea.vmem %s1720_s24, 65536  ;;  %p1722_p8 = scmp.lt.s32.totalorder %s1964_s6, %s1720_s24 }
  0x45   : > { %p1717_p3 = pnand %p1715_p1, %p1701_p12  ;;  %p1723_p0 = scmp.lt.s32.totalorder %s1721_s30, %s1714_s23 }
  0x47   : > { %p1718_p6 = pneg %p1717_p3  ;;  %p1724_p2 = por %p1723_p0, %p1722_p8 }
  0x49   : > { %p1725_p7 = pnand %p1724_p2, %p1718_p6 }
  0x4b   : > { %1728 = shalt.err (!%p1725_p7)
}
  0x4c   : > { %s1821_s18 = smov 1024   ;;  %p2378_p12 = scmp.ne.s32.totalorder %s2374_s22, 0 }
  0x4d   : > { %1607 = dma.hbm_to_vmem [thread:$0]  (!%p2377_p10), %s1959_s5, 32768, %s1964_s6, %s1966_s16, %s1821_s18, %s1818_s8, %s1819_s15  }
  0x4e   : > { %185 = sbr.rel (%p2378_p12) target bundleno = 480 (0x1e0), region = 28  ;;  %p2379_p5 = scmp.ne.s32.totalorder (!%p2378_p12), %s2369_s17, 0 }
  0x55   : > { %1782 = dma.done.wait (%p2379_p5), [#allocation4], 4096  }
  0x56   : > { %1784 = vsyncadd (%p2379_p5), [#allocation4], 4294963200  ;;  %s2003_s3 = sand.u32 1, %s1799_s10   ;;  %p2380_p10 = scmp.ne.s32.totalorder %s2371_s19, 0 }
  0x57   : > { %s1295_s26 = sshll.u32 %s2003_s3, 11  ;;  %s192_s25 = scalar_lea.sflag [#allocation7], %s2003_s3 }
  0x58   : > { %s2007_s29 = scalar_lea.vmem [#allocation6], %s1295_s26 }
  0x59   : > { %1786 = dma.done.wait (%p2380_p10), %s192_s25, 32768  }
  0x5a   : > { %1788 = vsyncadd (%p2380_p10), %s192_s25, 4294934528  ;;  %v323_v0 = vld [vmem:[%s2007_s29 + $0x8] sm:$0xff]  ;;  %v325_v2 = vld [vmem:[%s2007_s29 + $0x18] sm:$0xff]  ;;  %s1296_s17 = sshll.u32 %s2003_s3, 8  ;;  %s1303_s22 = sshll.u32 %s1807_s12, 9 }
  0x5b   : > { %v327_v1 = vld [vmem:[%s2007_s29 + $0x28] sm:$0xff]  ;;  %v329_v4 = vld [vmem:[%s2007_s29 + $0x38] sm:$0xff]  ;;  %v322_v5 = vld [vmem:[%s2007_s29] sm:$0xff]  ;;  %s2270_s19 = scalar_lea.vmem [#allocation8], %s1296_s17  ;;  %s2305_s6 = scalar_lea.hbm %s2362_s2, %s1303_s22 }
  0x5c   : > { %v1304_v3 = vpack.c.bf16 %v327_v1, %v323_v0  ;;  %v326_v6 = vld [vmem:[%s2007_s29 + $0x20] sm:$0xff]  ;;  %v1432_v7 = vpack.c.bf16 %v329_v4, %v325_v2  ;;  %v324_v9 = vld [vmem:[%s2007_s29 + $0x10] sm:$0xff]  ;;  %v331_v11 = vld [vmem:[%s2007_s29 + $0x48] sm:$0xff]  ;;  %s1178_s8 = sshll.u32 %s2270_s19, 4  ;;  %s1162_s12 = scalar_lea.sflag [#allocation5], %s2003_s3  ;;  %s2307_s8 = int_to_ptr.vmem [resolvable:$true] %s1178_s8 }
  0x5d   : > { %v1306_v8 = vpack.c.bf16 %v326_v6, %v322_v5  ;;  %v328_v10 = vld [vmem:[%s2007_s29 + $0x30] sm:$0xff]  ;;  %v335_v13 = vld [vmem:[%s2007_s29 + $0x68] sm:$0xff]  ;;  %v333_v14 = vld [vmem:[%s2007_s29 + $0x58] sm:$0xff]  ;;  %s1729_s16 = scalar_lea.vmem %s2307_s8, 4096  ;;  %p2381_p11 = scmp.ne.s32.totalorder %s2372_s20, 0 }
  0x5e   : > { %1305 = vmatprep.subr.bf16.mxu0 %v1304_v3  ;;  %v1434_v12 = vpack.c.bf16 %v328_v10, %v324_v9  ;;  %v337_v15 = vld [vmem:[%s2007_s29 + $0x78] sm:$0xff]  ;;  %1433 = vmatprep.subr.bf16.mxu1 %v1432_v7  ;;  %v1308_v16 = vpack.c.bf16 %v335_v13, %v331_v11  ;;  %v330_v18 = vld [vmem:[%s2007_s29 + $0x40] sm:$0xff]  ;;  %v332_v20 = vld [vmem:[%s2007_s29 + $0x50] sm:$0xff]  ;;  %p1730_p9 = scmp.ne.s32.totalorder %s2307_s8, %s1729_s16  ;;  %s1822_s4 = smov [#allocation8]  }
  0x5f   : > { %1307 = vmatpush1.bf16.msra.mxu0 %v1306_v8  ;;  %v1436_v17 = vpack.c.bf16 %v337_v15, %v333_v14  ;;  %v334_v19 = vld [vmem:[%s2007_s29 + $0x60] sm:$0xff]  ;;  %v336_v22 = vld [vmem:[%s2007_s29 + $0x70] sm:$0xff]  ;;  %v339_v23 = vld [vmem:[%s2007_s29 + $0x88] sm:$0xff]  ;;  %s1733_s23 = sshll.u32 %s1822_s4, 4  ;;  %s1734_s23 = int_to_ptr.vmem [resolvable:$false] %s1733_s23 }
  0x60   : > { %1435 = vmatpush1.bf16.msra.mxu1 %v1434_v12  ;;  %v1310_v21 = vpack.c.bf16 %v334_v19, %v330_v18  ;;  %v343_v24 = vld [vmem:[%s2007_s29 + $0xa8] sm:$0xff]  ;;  %1309 = vmatprep.subr.bf16.mxu0 %v1308_v16  ;;  %v1438_v25 = vpack.c.bf16 %v336_v22, %v332_v20  ;;  %v341_v27 = vld [vmem:[%s2007_s29 + $0x98] sm:$0xff]  ;;  %v338_v29 = vld [vmem:[%s2007_s29 + $0x80] sm:$0xff]  ;;  %p1731_p13 = pnand %p1730_p9, %p2381_p11  ;;  %s1735_s28 = scalar_lea.vmem %s1734_s23, 8192 }
  0x61   : > { %1437 = vmatprep.subr.bf16.mxu1 %v1436_v17  ;;  %v1312_v26 = vpack.c.bf16 %v343_v24, %v339_v23  ;;  %v345_v28 = vld [vmem:[%s2007_s29 + $0xb8] sm:$0xff]  ;;  %v342_v31 = vld [vmem:[%s2007_s29 + $0xa0] sm:$0xff]  ;;  %v340_v32 = vld [vmem:[%s2007_s29 + $0x90] sm:$0xff]  ;;  %p1736_p1 = scmp.lt.s32.totalorder %s2307_s8, %s1734_s23  ;;  %p1737_p3 = scmp.lt.s32.totalorder %s1735_s28, %s1729_s16 }
  0x62   : > { %v1440_v30 = vpack.c.bf16 %v345_v28, %v341_v27  ;;  %v344_v33 = vld [vmem:[%s2007_s29 + $0xb0] sm:$0xff]  ;;  %v1314_v34 = vpack.c.bf16 %v342_v31, %v338_v29  ;;  %v347_v35 = vld [vmem:[%s2007_s29 + $0xc8] sm:$0xff]  ;;  %v349_v37 = vld [vmem:[%s2007_s29 + $0xd8] sm:$0xff]  ;;  %p1732_p4 = pneg %p1731_p13 }
  0x63   : > { %1311 = vmatpush1.bf16.msra.mxu0 %v1310_v21  ;;  %v351_v36 = vld [vmem:[%s2007_s29 + $0xe8] sm:$0xff]  ;;  %v1442_v38 = vpack.c.bf16 %v344_v33, %v340_v32  ;;  %v353_v40 = vld [vmem:[%s2007_s29 + $0xf8] sm:$0xff]  ;;  %v346_v41 = vld [vmem:[%s2007_s29 + $0xc0] sm:$0xff]  ;;  %p1738_p6 = por %p1737_p3, %p1736_p1 }
  0x64   : > { %1439 = vmatpush1.bf16.msra.mxu1 %v1438_v25  ;;  %1313 = vmatprep.subr.bf16.mxu0 %v1312_v26  ;;  %v1316_v39 = vpack.c.bf16 %v351_v36, %v347_v35  ;;  %v350_v42 = vld [vmem:[%s2007_s29 + $0xe0] sm:$0xff]  ;;  %v1444_v43 = vpack.c.bf16 %v353_v40, %v349_v37  ;;  %v348_v44 = vld [vmem:[%s2007_s29 + $0xd0] sm:$0xff]  ;;  %v355_v46 = vld [vmem:[%s2007_s29 + $0x108] sm:$0xff] }
  0x65   : > { %1441 = vmatprep.subr.bf16.mxu1 %v1440_v30  ;;  %v352_v45 = vld [vmem:[%s2007_s29 + $0xf0] sm:$0xff]  ;;  %v359_v47 = vld [vmem:[%s2007_s29 + $0x128] sm:$0xff]  ;;  %v357_v48 = vld [vmem:[%s2007_s29 + $0x118] sm:$0xff]  ;;  %v1318_v50 = vpack.c.bf16 %v350_v42, %v346_v41  ;;  %p1739_p8 = pnand %p1738_p6, %p1732_p4 }
  0x66   : > { %v361_v49 = vld [vmem:[%s2007_s29 + $0x138] sm:$0xff]  ;;  %v1446_v51 = vpack.c.bf16 %v352_v45, %v348_v44  ;;  %v1320_v52 = vpack.c.bf16 %v359_v47, %v355_v46  ;;  %v354_v53 = vld [vmem:[%s2007_s29 + $0x100] sm:$0xff]  ;;  %v356_v55 = vld [vmem:[%s2007_s29 + $0x110] sm:$0xff] }
  0x67   : > { %1315 = vmatpush1.bf16.msra.mxu0 %v1314_v34  ;;  %v358_v54 = vld [vmem:[%s2007_s29 + $0x120] sm:$0xff]  ;;  %v1448_v56 = vpack.c.bf16 %v361_v49, %v357_v48  ;;  %v360_v57 = vld [vmem:[%s2007_s29 + $0x130] sm:$0xff]  ;;  %v363_v58 = vld [vmem:[%s2007_s29 + $0x148] sm:$0xff] }
  0x68   : > { %1443 = vmatpush1.bf16.msra.mxu1 %v1442_v38  ;;  %1317 = vmatprep.subr.bf16.mxu0 %v1316_v39  ;;  %v367_v59 = vld [vmem:[%s2007_s29 + $0x168] sm:$0xff]  ;;  %v365_v60 = vld [vmem:[%s2007_s29 + $0x158] sm:$0xff]  ;;  %v1322_v62 = vpack.c.bf16 %v358_v54, %v354_v53  ;;  %v1450_v63 = vpack.c.bf16 %v360_v57, %v356_v55  ;;  %v362_v1 = vld [vmem:[%s2007_s29 + $0x140] sm:$0xff] }
  0x69   : > { %1445 = vmatprep.subr.bf16.mxu1 %v1444_v43  ;;  %v369_v61 = vld [vmem:[%s2007_s29 + $0x178] sm:$0xff]  ;;  %v1324_v0 = vpack.c.bf16 %v367_v59, %v363_v58  ;;  %v366_v2 = vld [vmem:[%s2007_s29 + $0x160] sm:$0xff]  ;;  %v364_v3 = vld [vmem:[%s2007_s29 + $0x150] sm:$0xff] }
  0x6a   : > { %v1452_v4 = vpack.c.bf16 %v369_v61, %v365_v60  ;;  %v368_v5 = vld [vmem:[%s2007_s29 + $0x170] sm:$0xff]  ;;  %v371_v6 = vld [vmem:[%s2007_s29 + $0x188] sm:$0xff]  ;;  %v373_v8 = vld [vmem:[%s2007_s29 + $0x198] sm:$0xff]  ;;  %v1326_v10 = vpack.c.bf16 %v366_v2, %v362_v1 }
  0x6b   : > { %1319 = vmatpush1.bf16.msra.mxu0 %v1318_v50  ;;  %v375_v7 = vld [vmem:[%s2007_s29 + $0x1a8] sm:$0xff]  ;;  %v377_v9 = vld [vmem:[%s2007_s29 + $0x1b8] sm:$0xff]  ;;  %v1454_v11 = vpack.c.bf16 %v368_v5, %v364_v3  ;;  %v370_v13 = vld [vmem:[%s2007_s29 + $0x180] sm:$0xff] }
  0x6c   : > { %1447 = vmatpush1.bf16.msra.mxu1 %v1446_v51  ;;  %1321 = vmatprep.subr.bf16.mxu0 %v1320_v52  ;;  %v1328_v12 = vpack.c.bf16 %v375_v7, %v371_v6  ;;  %v374_v14 = vld [vmem:[%s2007_s29 + $0x1a0] sm:$0xff]  ;;  %v372_v15 = vld [vmem:[%s2007_s29 + $0x190] sm:$0xff]  ;;  %v1456_v16 = vpack.c.bf16 %v377_v9, %v373_v8  ;;  %v379_v18 = vld [vmem:[%s2007_s29 + $0x1c8] sm:$0xff] }
  0x6d   : > { %1449 = vmatprep.subr.bf16.mxu1 %v1448_v56  ;;  %v376_v17 = vld [vmem:[%s2007_s29 + $0x1b0] sm:$0xff]  ;;  %v383_v19 = vld [vmem:[%s2007_s29 + $0x1e8] sm:$0xff]  ;;  %v381_v20 = vld [vmem:[%s2007_s29 + $0x1d8] sm:$0xff]  ;;  %v1330_v22 = vpack.c.bf16 %v374_v14, %v370_v13 }
  0x6e   : > { %v385_v21 = vld [vmem:[%s2007_s29 + $0x1f8] sm:$0xff]  ;;  %v1458_v23 = vpack.c.bf16 %v376_v17, %v372_v15  ;;  %v1332_v24 = vpack.c.bf16 %v383_v19, %v379_v18  ;;  %v378_v25 = vld [vmem:[%s2007_s29 + $0x1c0] sm:$0xff]  ;;  %v380_v27 = vld [vmem:[%s2007_s29 + $0x1d0] sm:$0xff] }
  0x6f   : > { %1323 = vmatpush1.bf16.msra.mxu0 %v1322_v62  ;;  %v382_v26 = vld [vmem:[%s2007_s29 + $0x1e0] sm:$0xff]  ;;  %v1460_v28 = vpack.c.bf16 %v385_v21, %v381_v20  ;;  %v384_v29 = vld [vmem:[%s2007_s29 + $0x1f0] sm:$0xff]  ;;  %v387_v30 = vld [vmem:[%s2007_s29 + $0x208] sm:$0xff] }
  0x70   : > { %1451 = vmatpush1.bf16.msra.mxu1 %v1450_v63  ;;  %1325 = vmatprep.subr.bf16.mxu0 %v1324_v0  ;;  %v391_v31 = vld [vmem:[%s2007_s29 + $0x228] sm:$0xff]  ;;  %v389_v32 = vld [vmem:[%s2007_s29 + $0x218] sm:$0xff]  ;;  %v1334_v34 = vpack.c.bf16 %v382_v26, %v378_v25  ;;  %v1462_v35 = vpack.c.bf16 %v384_v29, %v380_v27  ;;  %v386_v37 = vld [vmem:[%s2007_s29 + $0x200] sm:$0xff] }
  0x71   : > { %1453 = vmatprep.subr.bf16.mxu1 %v1452_v4  ;;  %v393_v33 = vld [vmem:[%s2007_s29 + $0x238] sm:$0xff]  ;;  %v1336_v36 = vpack.c.bf16 %v391_v31, %v387_v30  ;;  %v390_v38 = vld [vmem:[%s2007_s29 + $0x220] sm:$0xff]  ;;  %v388_v39 = vld [vmem:[%s2007_s29 + $0x210] sm:$0xff] }
  0x72   : > { %v1464_v40 = vpack.c.bf16 %v393_v33, %v389_v32  ;;  %v392_v41 = vld [vmem:[%s2007_s29 + $0x230] sm:$0xff]  ;;  %v395_v42 = vld [vmem:[%s2007_s29 + $0x248] sm:$0xff]  ;;  %v397_v44 = vld [vmem:[%s2007_s29 + $0x258] sm:$0xff]  ;;  %v1338_v46 = vpack.c.bf16 %v390_v38, %v386_v37 }
  0x73   : > { %1327 = vmatpush1.bf16.msra.mxu0 %v1326_v10  ;;  %v399_v43 = vld [vmem:[%s2007_s29 + $0x268] sm:$0xff]  ;;  %v401_v45 = vld [vmem:[%s2007_s29 + $0x278] sm:$0xff]  ;;  %v1466_v47 = vpack.c.bf16 %v392_v41, %v388_v39  ;;  %v394_v49 = vld [vmem:[%s2007_s29 + $0x240] sm:$0xff] }
  0x74   : > { %1455 = vmatpush1.bf16.msra.mxu1 %v1454_v11  ;;  %1329 = vmatprep.subr.bf16.mxu0 %v1328_v12  ;;  %v1340_v48 = vpack.c.bf16 %v399_v43, %v395_v42  ;;  %v398_v50 = vld [vmem:[%s2007_s29 + $0x260] sm:$0xff]  ;;  %v396_v51 = vld [vmem:[%s2007_s29 + $0x250] sm:$0xff]  ;;  %v1468_v52 = vpack.c.bf16 %v401_v45, %v397_v44  ;;  %v403_v54 = vld [vmem:[%s2007_s29 + $0x288] sm:$0xff] }
  0x75   : > { %1457 = vmatprep.subr.bf16.mxu1 %v1456_v16  ;;  %v400_v53 = vld [vmem:[%s2007_s29 + $0x270] sm:$0xff]  ;;  %v407_v55 = vld [vmem:[%s2007_s29 + $0x2a8] sm:$0xff]  ;;  %v405_v56 = vld [vmem:[%s2007_s29 + $0x298] sm:$0xff]  ;;  %v1342_v58 = vpack.c.bf16 %v398_v50, %v394_v49 }
  0x76   : > { %v409_v57 = vld [vmem:[%s2007_s29 + $0x2b8] sm:$0xff]  ;;  %v1470_v59 = vpack.c.bf16 %v400_v53, %v396_v51  ;;  %v1344_v60 = vpack.c.bf16 %v407_v55, %v403_v54  ;;  %v402_v61 = vld [vmem:[%s2007_s29 + $0x280] sm:$0xff]  ;;  %v404_v63 = vld [vmem:[%s2007_s29 + $0x290] sm:$0xff] }
  0x77   : > { %1331 = vmatpush1.bf16.msra.mxu0 %v1330_v22  ;;  %v406_v62 = vld [vmem:[%s2007_s29 + $0x2a0] sm:$0xff]  ;;  %v1472_v0 = vpack.c.bf16 %v409_v57, %v405_v56  ;;  %v408_v1 = vld [vmem:[%s2007_s29 + $0x2b0] sm:$0xff]  ;;  %v411_v2 = vld [vmem:[%s2007_s29 + $0x2c8] sm:$0xff] }
  0x78   : > { %1459 = vmatpush1.bf16.msra.mxu1 %v1458_v23  ;;  %1333 = vmatprep.subr.bf16.mxu0 %v1332_v24  ;;  %v415_v3 = vld [vmem:[%s2007_s29 + $0x2e8] sm:$0xff]  ;;  %v413_v4 = vld [vmem:[%s2007_s29 + $0x2d8] sm:$0xff]  ;;  %v1346_v6 = vpack.c.bf16 %v406_v62, %v402_v61  ;;  %v410_v7 = vld [vmem:[%s2007_s29 + $0x2c0] sm:$0xff]  ;;  %v1474_v8 = vpack.c.bf16 %v408_v1, %v404_v63 }
  0x79   : > { %1461 = vmatprep.subr.bf16.mxu1 %v1460_v28  ;;  %v417_v5 = vld [vmem:[%s2007_s29 + $0x2f8] sm:$0xff]  ;;  %v1348_v9 = vpack.c.bf16 %v415_v3, %v411_v2  ;;  %v414_v10 = vld [vmem:[%s2007_s29 + $0x2e0] sm:$0xff]  ;;  %v412_v11 = vld [vmem:[%s2007_s29 + $0x2d0] sm:$0xff] }
  0x7a   : > { %v416_v12 = vld [vmem:[%s2007_s29 + $0x2f0] sm:$0xff]  ;;  %v1476_v13 = vpack.c.bf16 %v417_v5, %v413_v4  ;;  %v419_v14 = vld [vmem:[%s2007_s29 + $0x308] sm:$0xff]  ;;  %v421_v17 = vld [vmem:[%s2007_s29 + $0x318] sm:$0xff]  ;;  %v1350_v19 = vpack.c.bf16 %v414_v10, %v410_v7 }
  0x7b   : > { %1335 = vmatpush1.bf16.msra.mxu0 %v1334_v34  ;;  %v423_v15 = vld [vmem:[%s2007_s29 + $0x328] sm:$0xff]  ;;  %v425_v18 = vld [vmem:[%s2007_s29 + $0x338] sm:$0xff]  ;;  %v1478_v20 = vpack.c.bf16 %v416_v12, %v412_v11  ;;  %v418_v22 = vld [vmem:[%s2007_s29 + $0x300] sm:$0xff] }
  0x7c   : > { %1463 = vmatpush1.bf16.msra.mxu1 %v1462_v35  ;;  %1337 = vmatprep.subr.bf16.mxu0 %v1336_v36  ;;  %v291_v16 = vld [vmem:[#allocation3 + $0x8] sm:$0xff]  ;;  %v1352_v21 = vpack.c.bf16 %v423_v15, %v419_v14  ;;  %v422_v23 = vld [vmem:[%s2007_s29 + $0x320] sm:$0xff]  ;;  %v420_v24 = vld [vmem:[%s2007_s29 + $0x310] sm:$0xff]  ;;  %v1480_v25 = vpack.c.bf16 %v425_v18, %v421_v17 }
  0x7d   : > { %1465 = vmatprep.subr.bf16.mxu1 %v1464_v40  ;;  %642 = vmatprep.mubr.f32.mxu0 %v291_v16  ;;  %v424_v26 = vld [vmem:[%s2007_s29 + $0x330] sm:$0xff]  ;;  %v427_v27 = vld [vmem:[%s2007_s29 + $0x348] sm:$0xff]  ;;  %v429_v29 = vld [vmem:[%s2007_s29 + $0x358] sm:$0xff]  ;;  %v1354_v31 = vpack.c.bf16 %v422_v23, %v418_v22 }
  0x7e   : > { %868 = vmatprep.mubr.f32.mxu1 %v291_v16  ;;  %v431_v28 = vld [vmem:[%s2007_s29 + $0x368] sm:$0xff]  ;;  %v433_v30 = vld [vmem:[%s2007_s29 + $0x378] sm:$0xff]  ;;  %v1482_v32 = vpack.c.bf16 %v424_v26, %v420_v24  ;;  %v426_v34 = vld [vmem:[%s2007_s29 + $0x340] sm:$0xff] }
  0x7f   : > { %1339 = vmatpush1.bf16.msra.mxu0 %v1338_v46  ;;  %v1356_v33 = vpack.c.bf16 %v431_v28, %v427_v27  ;;  %v430_v35 = vld [vmem:[%s2007_s29 + $0x360] sm:$0xff]  ;;  %v428_v36 = vld [vmem:[%s2007_s29 + $0x350] sm:$0xff]  ;;  %v1484_v37 = vpack.c.bf16 %v433_v30, %v429_v29  ;;  %v435_v39 = vld [vmem:[%s2007_s29 + $0x388] sm:$0xff] }
  0x80   : > { %1467 = vmatpush1.bf16.msra.mxu1 %v1466_v47  ;;  %1341 = vmatprep.subr.bf16.mxu0 %v1340_v48  ;;  %v432_v38 = vld [vmem:[%s2007_s29 + $0x370] sm:$0xff]  ;;  %v439_v40 = vld [vmem:[%s2007_s29 + $0x3a8] sm:$0xff]  ;;  %v437_v41 = vld [vmem:[%s2007_s29 + $0x398] sm:$0xff]  ;;  %v1358_v43 = vpack.c.bf16 %v430_v35, %v426_v34 }
  0x81   : > { %1469 = vmatprep.subr.bf16.mxu1 %v1468_v52  ;;  %v441_v42 = vld [vmem:[%s2007_s29 + $0x3b8] sm:$0xff]  ;;  %v1486_v44 = vpack.c.bf16 %v432_v38, %v428_v36  ;;  %v1360_v45 = vpack.c.bf16 %v439_v40, %v435_v39  ;;  %v434_v46 = vld [vmem:[%s2007_s29 + $0x380] sm:$0xff]  ;;  %v436_v48 = vld [vmem:[%s2007_s29 + $0x390] sm:$0xff] }
  0x82   : > { %v438_v47 = vld [vmem:[%s2007_s29 + $0x3a0] sm:$0xff]  ;;  %v1488_v49 = vpack.c.bf16 %v441_v42, %v437_v41  ;;  %v440_v50 = vld [vmem:[%s2007_s29 + $0x3b0] sm:$0xff]  ;;  %v443_v51 = vld [vmem:[%s2007_s29 + $0x3c8] sm:$0xff] }
  0x83   : > { %1343 = vmatpush1.bf16.msra.mxu0 %v1342_v58  ;;  %v447_v52 = vld [vmem:[%s2007_s29 + $0x3e8] sm:$0xff]  ;;  %v445_v53 = vld [vmem:[%s2007_s29 + $0x3d8] sm:$0xff]  ;;  %v1362_v55 = vpack.c.bf16 %v438_v47, %v434_v46  ;;  %v1490_v56 = vpack.c.bf16 %v440_v50, %v436_v48  ;;  %v442_v58 = vld [vmem:[%s2007_s29 + $0x3c0] sm:$0xff] }
  0x84   : > { %1471 = vmatpush1.bf16.msra.mxu1 %v1470_v59  ;;  %1345 = vmatprep.subr.bf16.mxu0 %v1344_v60  ;;  %v449_v54 = vld [vmem:[%s2007_s29 + $0x3f8] sm:$0xff]  ;;  %v1364_v57 = vpack.c.bf16 %v447_v52, %v443_v51  ;;  %v446_v59 = vld [vmem:[%s2007_s29 + $0x3e0] sm:$0xff]  ;;  %v444_v60 = vld [vmem:[%s2007_s29 + $0x3d0] sm:$0xff] }
  0x85   : > { %1473 = vmatprep.subr.bf16.mxu1 %v1472_v0  ;;  %v1492_v61 = vpack.c.bf16 %v449_v54, %v445_v53  ;;  %v448_v62 = vld [vmem:[%s2007_s29 + $0x3f0] sm:$0xff]  ;;  %v451_v63 = vld [vmem:[%s2007_s29 + $0x408] sm:$0xff]  ;;  %v453_v1 = vld [vmem:[%s2007_s29 + $0x418] sm:$0xff]  ;;  %v1366_v3 = vpack.c.bf16 %v446_v59, %v442_v58 }
  0x86   : > { %v455_v0 = vld [vmem:[%s2007_s29 + $0x428] sm:$0xff]  ;;  %v457_v2 = vld [vmem:[%s2007_s29 + $0x438] sm:$0xff]  ;;  %v1494_v4 = vpack.c.bf16 %v448_v62, %v444_v60  ;;  %v454_v7 = vld [vmem:[%s2007_s29 + $0x420] sm:$0xff] }
  0x87   : > { %1347 = vmatpush1.bf16.msra.mxu0 %v1346_v6  ;;  %v1368_v5 = vpack.c.bf16 %v455_v0, %v451_v63  ;;  %v450_v6 = vld [vmem:[%s2007_s29 + $0x400] sm:$0xff]  ;;  %v456_v10 = vld [vmem:[%s2007_s29 + $0x430] sm:$0xff]  ;;  %v459_v11 = vld [vmem:[%s2007_s29 + $0x448] sm:$0xff] }
  0x88   : > { %1475 = vmatpush1.bf16.msra.mxu1 %v1474_v8  ;;  %1349 = vmatprep.subr.bf16.mxu0 %v1348_v9  ;;  %v452_v8 = vld [vmem:[%s2007_s29 + $0x410] sm:$0xff]  ;;  %v1496_v9 = vpack.c.bf16 %v457_v2, %v453_v1  ;;  %v463_v12 = vld [vmem:[%s2007_s29 + $0x468] sm:$0xff]  ;;  %v465_v14 = vld [vmem:[%s2007_s29 + $0x478] sm:$0xff]  ;;  %v1370_v16 = vpack.c.bf16 %v454_v7, %v450_v6 }
  0x89   : > { %1477 = vmatprep.subr.bf16.mxu1 %v1476_v13  ;;  %v461_v13 = vld [vmem:[%s2007_s29 + $0x458] sm:$0xff]  ;;  %v290_v15 = vld [vmem:[#allocation3] sm:$0xff]  ;;  %v1498_v17 = vpack.c.bf16 %v456_v10, %v452_v8  ;;  %v1372_v18 = vpack.c.bf16 %v463_v12, %v459_v11  ;;  %v464_v23 = vld [vmem:[%s2007_s29 + $0x470] sm:$0xff] }
  0x8a   : > { %v1500_v22 = vpack.c.bf16 %v465_v14, %v461_v13  ;;  %v467_v24 = vld [vmem:[%s2007_s29 + $0x488] sm:$0xff]  ;;  %v469_v26 = vld [vmem:[%s2007_s29 + $0x498] sm:$0xff]  ;;  %v294_v30 = vld [vmem:[#allocation3 + $0x20] sm:$0xff] }
  0x8b   : > { %1351 = vmatpush1.bf16.msra.mxu0 %v1350_v19  ;;  %v458_v19 = vld [vmem:[%s2007_s29 + $0x440] sm:$0xff]  ;;  %v473_v27 = vld [vmem:[%s2007_s29 + $0x4b8] sm:$0xff]  ;;  %v295_v28 = vld [vmem:[#allocation3 + $0x28] sm:$0xff] }
  0x8c   : > { %1479 = vmatpush1.bf16.msra.mxu1 %v1478_v20  ;;  %1353 = vmatprep.subr.bf16.mxu0 %v1352_v21  ;;  %v462_v20 = vld [vmem:[%s2007_s29 + $0x460] sm:$0xff]  ;;  %v460_v21 = vld [vmem:[%s2007_s29 + $0x450] sm:$0xff]  ;;  %v1504_v36 = vpack.c.bf16 %v473_v27, %v469_v26  ;;  %v475_v38 = vld [vmem:[%s2007_s29 + $0x4c8] sm:$0xff] }
  0x8d   : > { %1481 = vmatprep.subr.bf16.mxu1 %v1480_v25  ;;  %v471_v25 = vld [vmem:[%s2007_s29 + $0x4a8] sm:$0xff]  ;;  %v1374_v29 = vpack.c.bf16 %v462_v20, %v458_v19  ;;  %v470_v34 = vld [vmem:[%s2007_s29 + $0x4a0] sm:$0xff]  ;;  %v468_v35 = vld [vmem:[%s2007_s29 + $0x490] sm:$0xff] }
  0x8e   : > { %v479_v39 = vld [vmem:[%s2007_s29 + $0x4e8] sm:$0xff]  ;;  %v477_v40 = vld [vmem:[%s2007_s29 + $0x4d8] sm:$0xff]  ;;  %v474_v47 = vld [vmem:[%s2007_s29 + $0x4c0] sm:$0xff] }
  0x8f   : > { %1355 = vmatpush1.bf16.msra.mxu0 %v1354_v31  ;;  %v1502_v31 = vpack.c.bf16 %v464_v23, %v460_v21  ;;  %v481_v41 = vld [vmem:[%s2007_s29 + $0x4f8] sm:$0xff]  ;;  %v299_v42 = vld [vmem:[#allocation3 + $0x48] sm:$0xff]  ;;  %v1380_v46 = vpack.c.bf16 %v479_v39, %v475_v38  ;;  %v478_v48 = vld [vmem:[%s2007_s29 + $0x4e0] sm:$0xff] }
  0x90   : > { %1483 = vmatpush1.bf16.msra.mxu1 %v1482_v32  ;;  %1357 = vmatprep.subr.bf16.mxu0 %v1356_v33  ;;  %v1376_v32 = vpack.c.bf16 %v471_v25, %v467_v24  ;;  %v466_v33 = vld [vmem:[%s2007_s29 + $0x480] sm:$0xff]  ;;  %v1508_v50 = vpack.c.bf16 %v481_v41, %v477_v40  ;;  %v480_v51 = vld [vmem:[%s2007_s29 + $0x4f0] sm:$0xff]  ;;  %v483_v52 = vld [vmem:[%s2007_s29 + $0x508] sm:$0xff] }
  0x91   : > { %1485 = vmatprep.subr.bf16.mxu1 %v1484_v37  ;;  %v472_v37 = vld [vmem:[%s2007_s29 + $0x4b0] sm:$0xff]  ;;  %v487_v53 = vld [vmem:[%s2007_s29 + $0x528] sm:$0xff]  ;;  %v485_v54 = vld [vmem:[%s2007_s29 + $0x518] sm:$0xff] }
  0x92   : > { %v302_v58 = vld [vmem:[#allocation3 + $0x60] sm:$0xff]  ;;  %v1384_v60 = vpack.c.bf16 %v487_v53, %v483_v52  ;;  %v484_v63 = vld [vmem:[%s2007_s29 + $0x510] sm:$0xff]  ;;  %v491_v2 = vld [vmem:[%s2007_s29 + $0x548] sm:$0xff] }
  0x93   : > { %1359 = vmatpush1.bf16.msra.mxu0 %v1358_v43  ;;  %v1378_v43 = vpack.c.bf16 %v470_v34, %v466_v33  ;;  %v486_v62 = vld [vmem:[%s2007_s29 + $0x520] sm:$0xff]  ;;  %v488_v1 = vld [vmem:[%s2007_s29 + $0x530] sm:$0xff]  ;;  %v307_v6 = vld [vmem:[#allocation3 + $0x88] sm:$0xff] }
  0x94   : > { %1487 = vmatpush1.bf16.msra.mxu1 %v1486_v44  ;;  %1361 = vmatprep.subr.bf16.mxu0 %v1360_v45  ;;  %v298_v44 = vld [vmem:[#allocation3 + $0x40] sm:$0xff]  ;;  %v1506_v45 = vpack.c.bf16 %v472_v37, %v468_v35  ;;  %v492_v13 = vld [vmem:[%s2007_s29 + $0x550] sm:$0xff]  ;;  %v505_v19 = vld [vmem:[%s2007_s29 + $0x5b8] sm:$0xff] }
  0x95   : > { %1489 = vmatprep.subr.bf16.mxu1 %v1488_v49  ;;  %v476_v49 = vld [vmem:[%s2007_s29 + $0x4d0] sm:$0xff]  ;;  %v306_v8 = vld [vmem:[#allocation3 + $0x80] sm:$0xff]  ;;  %v311_v20 = vld [vmem:[#allocation3 + $0xa8] sm:$0xff] }
  0x96   : > { %v1510_v59 = vpack.c.bf16 %v480_v51, %v476_v49  ;;  %v490_v11 = vld [vmem:[%s2007_s29 + $0x540] sm:$0xff]  ;;  %v500_v27 = vld [vmem:[%s2007_s29 + $0x590] sm:$0xff]  ;;  %v513_v33 = vld [vmem:[%s2007_s29 + $0x5f8] sm:$0xff] }
  0x97   : > { %1363 = vmatpush1.bf16.msra.mxu0 %v1362_v55  ;;  %v489_v55 = vld [vmem:[%s2007_s29 + $0x538] sm:$0xff]  ;;  %v494_v12 = vld [vmem:[%s2007_s29 + $0x560] sm:$0xff]  ;;  %v315_v34 = vld [vmem:[#allocation3 + $0xc8] sm:$0xff] }
  0x98   : > { %1491 = vmatpush1.bf16.msra.mxu1 %v1490_v56  ;;  %1365 = vmatprep.subr.bf16.mxu0 %v1364_v57  ;;  %v303_v56 = vld [vmem:[#allocation3 + $0x68] sm:$0xff]  ;;  %v1382_v57 = vpack.c.bf16 %v478_v48, %v474_v47  ;;  %v1512_v0 = vpack.c.bf16 %v489_v55, %v485_v54  ;;  %v1390_v21 = vpack.c.bf16 %v494_v12, %v490_v11  ;;  %v498_v25 = vld [vmem:[%s2007_s29 + $0x580] sm:$0xff]  ;;  %v508_v41 = vld [vmem:[%s2007_s29 + $0x5d0] sm:$0xff] }
  0x99   : > { %1493 = vmatprep.subr.bf16.mxu1 %v1492_v61  ;;  %v482_v61 = vld [vmem:[%s2007_s29 + $0x500] sm:$0xff]  ;;  %v521_v47 = vld [vmem:[%s2007_s29 + $0x638] sm:$0xff]  ;;  %v319_v48 = vld [vmem:[#allocation3 + $0xe8] sm:$0xff] }
  0x9a   : > { %v1386_v7 = vpack.c.bf16 %v486_v62, %v482_v61  ;;  %v502_v26 = vld [vmem:[%s2007_s29 + $0x5a0] sm:$0xff]  ;;  %v516_v55 = vld [vmem:[%s2007_s29 + $0x610] sm:$0xff]  ;;  %v529_v61 = vld [vmem:[%s2007_s29 + $0x678] sm:$0xff] }
  0x9b   : > { %1367 = vmatpush1.bf16.msra.mxu0 %v1366_v3  ;;  %v495_v3 = vld [vmem:[%s2007_s29 + $0x568] sm:$0xff]  ;;  %v1394_v35 = vpack.c.bf16 %v502_v26, %v498_v25  ;;  %v506_v39 = vld [vmem:[%s2007_s29 + $0x5c0] sm:$0xff]  ;;  %v293_v62 = vld [vmem:[#allocation3 + $0x18] sm:$0xff] }
  0x9c   : > { %1495 = vmatpush1.bf16.msra.mxu1 %v1494_v4  ;;  %1369 = vmatprep.subr.bf16.mxu0 %v1368_v5  ;;  %v493_v4 = vld [vmem:[%s2007_s29 + $0x558] sm:$0xff]  ;;  %v1388_v10 = vpack.c.bf16 %v495_v3, %v491_v2  ;;  %v510_v40 = vld [vmem:[%s2007_s29 + $0x5e0] sm:$0xff] }
  0x9d   : > { %1497 = vmatprep.subr.bf16.mxu1 %v1496_v9  ;;  %v497_v5 = vld [vmem:[%s2007_s29 + $0x578] sm:$0xff]  ;;  %v1514_v9 = vpack.c.bf16 %v488_v1, %v484_v63  ;;  %v1398_v49 = vpack.c.bf16 %v510_v40, %v506_v39  ;;  %v514_v53 = vld [vmem:[%s2007_s29 + $0x600] sm:$0xff]  ;;  %v548_v40 = vld [vmem:[%s2007_s29 + $0x710] sm:$0xff] }
  0x9e   : > { %643 = vmatmul.mubr.f32.vlgmr.msra.gmra.mrb[0].mxu0 %v290_v15  ;;  %v1516_v14 = vpack.c.bf16 %v497_v5, %v493_v4  ;;  %v518_v54 = vld [vmem:[%s2007_s29 + $0x620] sm:$0xff]  ;;  %v524_v4 = vld [vmem:[%s2007_s29 + $0x650] sm:$0xff] }
  0x9f   : > { %1371 = vmatpush1.bf16.msra.mxu0 %v1370_v16  ;;  %869 = vmatmul.mubr.f32.vlgmr.msra.gmra.mrb[0].mxu1 %v290_v15  ;;  %v496_v15 = vld [vmem:[%s2007_s29 + $0x570] sm:$0xff]  ;;  %v499_v16 = vld [vmem:[%s2007_s29 + $0x588] sm:$0xff]  ;;  %v1402_v63 = vpack.c.bf16 %v518_v54, %v514_v53  ;;  %v522_v2 = vld [vmem:[%s2007_s29 + $0x640] sm:$0xff] }
  0xa0   : > { %1499 = vmatpush1.bf16.msra.mxu1 %v1498_v17  ;;  %1373 = vmatprep.subr.bf16.mxu0 %v1372_v18  ;;  %v503_v17 = vld [vmem:[%s2007_s29 + $0x5a8] sm:$0xff]  ;;  %v501_v18 = vld [vmem:[%s2007_s29 + $0x598] sm:$0xff]  ;;  %v1518_v23 = vpack.c.bf16 %v496_v15, %v492_v13  ;;  %v526_v3 = vld [vmem:[%s2007_s29 + $0x660] sm:$0xff] }
  0xa1   : > { %1501 = vmatprep.subr.bf16.mxu1 %v1500_v22  ;;  %648 = vmatprep.mubr.f32.mxu0 %v295_v28  ;;  %v310_v22 = vld [vmem:[#allocation3 + $0xa0] sm:$0xff]  ;;  %v1392_v24 = vpack.c.bf16 %v503_v17, %v499_v16  ;;  %v1406_v11 = vpack.c.bf16 %v526_v3, %v522_v2  ;;  %v532_v16 = vld [vmem:[%s2007_s29 + $0x690] sm:$0xff]  ;;  %v571_v3 = vld [vmem:[%s2007_s29 + $0x7c8] sm:$0xff] }
  0xa2   : > { %874 = vmatprep.mubr.f32.mxu1 %v295_v28  ;;  %649 = vmatmul.mubr.f32.gmra.mrb[2].mxu0 %v294_v30  ;;  %v1520_v28 = vpack.c.bf16 %v505_v19, %v501_v18  ;;  %v534_v15 = vld [vmem:[%s2007_s29 + $0x6a0] sm:$0xff]  ;;  %v536_v18 = vld [vmem:[%s2007_s29 + $0x6b0] sm:$0xff]  ;;  %v539_v19 = vld [vmem:[%s2007_s29 + $0x6c8] sm:$0xff] }
  0xa3   : > { %1375 = vmatpush1.bf16.msra.mxu0 %v1374_v29  ;;  %875 = vmatmul.mubr.f32.gmra.mrb[2].mxu1 %v294_v30  ;;  %v504_v29 = vld [vmem:[%s2007_s29 + $0x5b0] sm:$0xff]  ;;  %v507_v30 = vld [vmem:[%s2007_s29 + $0x5c8] sm:$0xff]  ;;  %v538_v26 = vld [vmem:[%s2007_s29 + $0x6c0] sm:$0xff] }
  0xa4   : > { %1503 = vmatpush1.bf16.msra.mxu1 %v1502_v31  ;;  %1377 = vmatprep.subr.bf16.mxu0 %v1376_v32  ;;  %v511_v31 = vld [vmem:[%s2007_s29 + $0x5e8] sm:$0xff]  ;;  %v509_v32 = vld [vmem:[%s2007_s29 + $0x5d8] sm:$0xff]  ;;  %v1522_v37 = vpack.c.bf16 %v504_v29, %v500_v27  ;;  %v542_v27 = vld [vmem:[%s2007_s29 + $0x6e0] sm:$0xff] }
  0xa5   : > { %1505 = vmatprep.subr.bf16.mxu1 %v1504_v36  ;;  %654 = vmatprep.mubr.f32.mxu0 %v299_v42  ;;  %v314_v36 = vld [vmem:[#allocation3 + $0xc0] sm:$0xff]  ;;  %v1396_v38 = vpack.c.bf16 %v511_v31, %v507_v30  ;;  %v544_v30 = vld [vmem:[%s2007_s29 + $0x6f0] sm:$0xff]  ;;  %v547_v31 = vld [vmem:[%s2007_s29 + $0x708] sm:$0xff] }
  0xa6   : > { %880 = vmatprep.mubr.f32.mxu1 %v299_v42  ;;  %655 = vmatmul.mubr.f32.gmra.mrb[4].mxu0 %v298_v44  ;;  %v1524_v42 = vpack.c.bf16 %v513_v33, %v509_v32  ;;  %v551_v32 = vld [vmem:[%s2007_s29 + $0x728] sm:$0xff]  ;;  %v549_v33 = vld [vmem:[%s2007_s29 + $0x718] sm:$0xff]  ;;  %v550_v39 = vld [vmem:[%s2007_s29 + $0x720] sm:$0xff] }
  0xa7   : > { %1379 = vmatpush1.bf16.msra.mxu0 %v1378_v43  ;;  %881 = vmatmul.mubr.f32.gmra.mrb[4].mxu1 %v298_v44  ;;  %v512_v43 = vld [vmem:[%s2007_s29 + $0x5f0] sm:$0xff]  ;;  %v515_v44 = vld [vmem:[%s2007_s29 + $0x608] sm:$0xff] }
  0xa8   : > { %1507 = vmatpush1.bf16.msra.mxu1 %v1506_v45  ;;  %1381 = vmatprep.subr.bf16.mxu0 %v1380_v46  ;;  %v519_v45 = vld [vmem:[%s2007_s29 + $0x628] sm:$0xff]  ;;  %v517_v46 = vld [vmem:[%s2007_s29 + $0x618] sm:$0xff]  ;;  %v1526_v51 = vpack.c.bf16 %v512_v43, %v508_v41  ;;  %v560_v54 = vld [vmem:[%s2007_s29 + $0x770] sm:$0xff] }
  0xa9   : > { %1509 = vmatprep.subr.bf16.mxu1 %v1508_v50  ;;  %660 = vmatprep.mubr.f32.mxu0 %v303_v56  ;;  %v318_v50 = vld [vmem:[#allocation3 + $0xe0] sm:$0xff]  ;;  %v1400_v52 = vpack.c.bf16 %v519_v45, %v515_v44  ;;  %v555_v43 = vld [vmem:[%s2007_s29 + $0x748] sm:$0xff]  ;;  %v557_v45 = vld [vmem:[%s2007_s29 + $0x758] sm:$0xff] }
  0xaa   : > { %886 = vmatprep.mubr.f32.mxu1 %v303_v56  ;;  %661 = vmatmul.mubr.f32.gmra.mrb[6].mxu0 %v302_v58  ;;  %v1528_v56 = vpack.c.bf16 %v521_v47, %v517_v46  ;;  %v559_v44 = vld [vmem:[%s2007_s29 + $0x768] sm:$0xff]  ;;  %v561_v46 = vld [vmem:[%s2007_s29 + $0x778] sm:$0xff]  ;;  %v568_v2 = vld [vmem:[%s2007_s29 + $0x7b0] sm:$0xff] }
  0xab   : > { %1383 = vmatpush1.bf16.msra.mxu0 %v1382_v57  ;;  %887 = vmatmul.mubr.f32.gmra.mrb[6].mxu1 %v302_v58  ;;  %v520_v57 = vld [vmem:[%s2007_s29 + $0x630] sm:$0xff]  ;;  %v523_v58 = vld [vmem:[%s2007_s29 + $0x648] sm:$0xff]  ;;  %v1548_v53 = vpack.c.bf16 %v561_v46, %v557_v45 }
  0xac   : > { %1511 = vmatpush1.bf16.msra.mxu1 %v1510_v59  ;;  %1385 = vmatprep.subr.bf16.mxu0 %v1384_v60  ;;  %v527_v59 = vld [vmem:[%s2007_s29 + $0x668] sm:$0xff]  ;;  %v525_v60 = vld [vmem:[%s2007_s29 + $0x658] sm:$0xff] }
  0xad   : > { %1513 = vmatprep.subr.bf16.mxu1 %v1512_v0  ;;  %666 = vmatprep.mubr.f32.mxu0 %v307_v6  ;;  %v1530_v0 = vpack.c.bf16 %v520_v57, %v516_v55  ;;  %v1404_v1 = vpack.c.bf16 %v527_v59, %v523_v58  ;;  %v1532_v5 = vpack.c.bf16 %v529_v61, %v525_v60  ;;  %v563_v55 = vld [vmem:[%s2007_s29 + $0x788] sm:$0xff]  ;;  %v565_v57 = vld [vmem:[%s2007_s29 + $0x798] sm:$0xff] }
  0xae   : > { %892 = vmatprep.mubr.f32.mxu1 %v307_v6  ;;  %667 = vmatmul.mubr.f32.gmra.mrb[8].mxu0 %v306_v8  ;;  %v528_v6 = vld [vmem:[%s2007_s29 + $0x670] sm:$0xff]  ;;  %v569_v58 = vld [vmem:[%s2007_s29 + $0x7b8] sm:$0xff] }
  0xaf   : > { %1387 = vmatpush1.bf16.msra.mxu0 %v1386_v7  ;;  %893 = vmatmul.mubr.f32.gmra.mrb[8].mxu1 %v306_v8  ;;  %v531_v7 = vld [vmem:[%s2007_s29 + $0x688] sm:$0xff]  ;;  %v1534_v12 = vpack.c.bf16 %v528_v6, %v524_v4  ;;  %v577_v6 = vld [vmem:[%s2007_s29 + $0x7f8] sm:$0xff] }
  0xb0   : > { %1515 = vmatpush1.bf16.msra.mxu1 %v1514_v9  ;;  %1389 = vmatprep.subr.bf16.mxu0 %v1388_v10  ;;  %v535_v8 = vld [vmem:[%s2007_s29 + $0x6a8] sm:$0xff]  ;;  %v533_v9 = vld [vmem:[%s2007_s29 + $0x698] sm:$0xff] }
  0xb1   : > { %1517 = vmatprep.subr.bf16.mxu1 %v1516_v14  ;;  %672 = vmatprep.mubr.f32.mxu0 %v311_v20  ;;  %v537_v10 = vld [vmem:[%s2007_s29 + $0x6b8] sm:$0xff]  ;;  %v1408_v13 = vpack.c.bf16 %v535_v8, %v531_v7  ;;  %v530_v14 = vld [vmem:[%s2007_s29 + $0x680] sm:$0xff]  ;;  %v575_v4 = vld [vmem:[%s2007_s29 + $0x7e8] sm:$0xff] }
  0xb2   : > { %898 = vmatprep.mubr.f32.mxu1 %v311_v20  ;;  %673 = vmatmul.mubr.f32.gmra.mrb[10].mxu0 %v310_v22  ;;  %v1536_v17 = vpack.c.bf16 %v537_v10, %v533_v9  ;;  %v543_v20 = vld [vmem:[%s2007_s29 + $0x6e8] sm:$0xff]  ;;  %v1428_v9 = vpack.c.bf16 %v575_v4, %v571_v3  ;;  %v570_v10 = vld [vmem:[%s2007_s29 + $0x7c0] sm:$0xff] }
  0xb3   : > { %1391 = vmatpush1.bf16.msra.mxu0 %v1390_v21  ;;  %899 = vmatmul.mubr.f32.gmra.mrb[10].mxu1 %v310_v22  ;;  %v541_v21 = vld [vmem:[%s2007_s29 + $0x6d8] sm:$0xff]  ;;  %v1412_v25 = vpack.c.bf16 %v543_v20, %v539_v19  ;;  %v296_v19 = vld [vmem:[#allocation3 + $0x30] sm:$0xff] }
  0xb4   : > { %1519 = vmatpush1.bf16.msra.mxu1 %v1518_v23  ;;  %1393 = vmatprep.subr.bf16.mxu0 %v1392_v24  ;;  %v545_v22 = vld [vmem:[%s2007_s29 + $0x6f8] sm:$0xff]  ;;  %v1410_v23 = vpack.c.bf16 %v534_v15, %v530_v14  ;;  %v1538_v24 = vpack.c.bf16 %v536_v18, %v532_v16  ;;  %v576_v14 = vld [vmem:[%s2007_s29 + $0x7f0] sm:$0xff] }
  0xb5   : > { %1521 = vmatprep.subr.bf16.mxu1 %v1520_v28  ;;  %678 = vmatprep.mubr.f32.mxu0 %v315_v34  ;;  %v540_v28 = vld [vmem:[%s2007_s29 + $0x6d0] sm:$0xff]  ;;  %v1540_v29 = vpack.c.bf16 %v545_v22, %v541_v21  ;;  %v297_v18 = vld [vmem:[#allocation3 + $0x38] sm:$0xff] }
  0xb6   : > { %904 = vmatprep.mubr.f32.mxu1 %v315_v34  ;;  %679 = vmatmul.mubr.f32.gmra.mrb[12].mxu0 %v314_v36  ;;  %v553_v34 = vld [vmem:[%s2007_s29 + $0x738] sm:$0xff]  ;;  %v300_v21 = vld [vmem:[#allocation3 + $0x50] sm:$0xff] }
  0xb7   : > { %1395 = vmatpush1.bf16.msra.mxu0 %v1394_v35  ;;  %905 = vmatmul.mubr.f32.gmra.mrb[12].mxu1 %v314_v36  ;;  %v1414_v35 = vpack.c.bf16 %v542_v27, %v538_v26  ;;  %v1542_v36 = vpack.c.bf16 %v544_v30, %v540_v28  ;;  %v1544_v41 = vpack.c.bf16 %v553_v34, %v549_v33  ;;  %v301_v20 = vld [vmem:[#allocation3 + $0x58] sm:$0xff]  ;;  %v312_v27 = vld [vmem:[#allocation3 + $0xb0] sm:$0xff] }
  0xb8   : > { %1523 = vmatpush1.bf16.msra.mxu1 %v1522_v37  ;;  %1397 = vmatprep.subr.bf16.mxu0 %v1396_v38  ;;  %v1416_v37 = vpack.c.bf16 %v551_v32, %v547_v31  ;;  %v546_v38 = vld [vmem:[%s2007_s29 + $0x700] sm:$0xff]  ;;  %v305_v22 = vld [vmem:[#allocation3 + $0x78] sm:$0xff]  ;;  %v320_v31 = vld [vmem:[#allocation3 + $0xf0] sm:$0xff] }
  0xb9   : > { %1525 = vmatprep.subr.bf16.mxu1 %v1524_v42  ;;  %684 = vmatprep.mubr.f32.mxu0 %v319_v48  ;;  %v552_v42 = vld [vmem:[%s2007_s29 + $0x730] sm:$0xff]  ;;  %v1418_v47 = vpack.c.bf16 %v550_v39, %v546_v38  ;;  %v313_v26 = vld [vmem:[#allocation3 + $0xb8] sm:$0xff] }
  0xba   : > { %910 = vmatprep.mubr.f32.mxu1 %v319_v48  ;;  %685 = vmatmul.mubr.f32.gmra.mrb[14].mxu0 %v318_v50  ;;  %v1546_v48 = vpack.c.bf16 %v552_v42, %v548_v40  ;;  %v317_v28 = vld [vmem:[#allocation3 + $0xd8] sm:$0xff] }
  0xbb   : > { %1399 = vmatpush1.bf16.msra.mxu0 %v1398_v49  ;;  %911 = vmatmul.mubr.f32.gmra.mrb[14].mxu1 %v318_v50  ;;  %v1420_v49 = vpack.c.bf16 %v559_v44, %v555_v43  ;;  %v554_v50 = vld [vmem:[%s2007_s29 + $0x740] sm:$0xff]  ;;  %v321_v30 = vld [vmem:[#allocation3 + $0xf8] sm:$0xff] }
  0xbc   : > { %1527 = vmatpush1.bf16.msra.mxu1 %v1526_v51  ;;  %1401 = vmatprep.subr.bf16.mxu0 %v1400_v52  ;;  %v558_v51 = vld [vmem:[%s2007_s29 + $0x760] sm:$0xff]  ;;  %v556_v52 = vld [vmem:[%s2007_s29 + $0x750] sm:$0xff] }
  0xbd   : > { %1529 = vmatprep.subr.bf16.mxu1 %v1528_v56  ;;  %755 = vmatprep.mubr.f32.mxu0 %v293_v62  ;;  %v567_v56 = vld [vmem:[%s2007_s29 + $0x7a8] sm:$0xff]  ;;  %v1422_v59 = vpack.c.bf16 %v558_v51, %v554_v50  ;;  %v1550_v60 = vpack.c.bf16 %v560_v54, %v556_v52 }
  0xbe   : > { %981 = vmatprep.mubr.f32.mxu1 %v293_v62  ;;  %v1424_v61 = vpack.c.bf16 %v567_v56, %v563_v55  ;;  %v562_v62 = vld [vmem:[%s2007_s29 + $0x780] sm:$0xff] }
  0xbf   : > { %1403 = vmatpush1.bf16.msra.mxu0 %v1402_v63  ;;  %v566_v63 = vld [vmem:[%s2007_s29 + $0x7a0] sm:$0xff] }
  0xc0   : > { %1531 = vmatpush1.bf16.msra.mxu1 %v1530_v0  ;;  %1405 = vmatprep.subr.bf16.mxu0 %v1404_v1  ;;  %v564_v0 = vld [vmem:[%s2007_s29 + $0x790] sm:$0xff]  ;;  %v1552_v1 = vpack.c.bf16 %v569_v58, %v565_v57  ;;  %v1426_v7 = vpack.c.bf16 %v566_v63, %v562_v62 }
  0xc1   : > { %1533 = vmatprep.subr.bf16.mxu1 %v1532_v5  ;;  %v573_v5 = vld [vmem:[%s2007_s29 + $0x7d8] sm:$0xff]  ;;  %v1554_v8 = vpack.c.bf16 %v568_v2, %v564_v0 }
  0xc3   : > { %1407 = vmatpush1.bf16.msra.mxu0 %v1406_v11  ;;  %v574_v11 = vld [vmem:[%s2007_s29 + $0x7e0] sm:$0xff] }
  0xc4   : > { %1535 = vmatpush1.bf16.msra.mxu1 %v1534_v12  ;;  %1409 = vmatprep.subr.bf16.mxu0 %v1408_v13  ;;  %v1556_v12 = vpack.c.bf16 %v577_v6, %v573_v5  ;;  %v572_v13 = vld [vmem:[%s2007_s29 + $0x7d0] sm:$0xff]  ;;  %v1430_v15 = vpack.c.bf16 %v574_v11, %v570_v10 }
  0xc5   : > { %1537 = vmatprep.subr.bf16.mxu1 %v1536_v17  ;;  %v1558_v16 = vpack.c.bf16 %v576_v14, %v572_v13  ;;  %v292_v17 = vld [vmem:[#allocation3 + $0x10] sm:$0xff] }
  0xc7   : > { %1411 = vmatpush1.bf16.msra.mxu0 %v1410_v23  ;;  %v304_v23 = vld [vmem:[#allocation3 + $0x70] sm:$0xff] }
  0xc8   : > { %1539 = vmatpush1.bf16.msra.mxu1 %v1538_v24  ;;  %1413 = vmatprep.subr.bf16.mxu0 %v1412_v25  ;;  %v309_v24 = vld [vmem:[#allocation3 + $0x98] sm:$0xff]  ;;  %v308_v25 = vld [vmem:[#allocation3 + $0x90] sm:$0xff] }
  0xc9   : > { %1541 = vmatprep.subr.bf16.mxu1 %v1540_v29  ;;  %v316_v29 = vld [vmem:[#allocation3 + $0xd0] sm:$0xff] }
  0xcb   : > { %1415 = vmatpush1.bf16.msra.mxu0 %v1414_v35 }
  0xcc   : > { %1543 = vmatpush1.bf16.msra.mxu1 %v1542_v36  ;;  %1417 = vmatprep.subr.bf16.mxu0 %v1416_v37 }
  0xcd   : > { %1545 = vmatprep.subr.bf16.mxu1 %v1544_v41 }
  0xcf   : > { %1419 = vmatpush1.bf16.msra.mxu0 %v1418_v47 }
  0xd0   : > { %1547 = vmatpush1.bf16.msra.mxu1 %v1546_v48  ;;  %1421 = vmatprep.subr.bf16.mxu0 %v1420_v49 }
  0xd1   : > { %1549 = vmatprep.subr.bf16.mxu1 %v1548_v53 }
  0xd3   : > { %1423 = vmatpush1.bf16.msra.mxu0 %v1422_v59 }
  0xd4   : > { %1551 = vmatpush1.bf16.msra.mxu1 %v1550_v60  ;;  %1425 = vmatprep.subr.bf16.mxu0 %v1424_v61 }
  0xd5   : > { %1553 = vmatprep.subr.bf16.mxu1 %v1552_v1 }
  0xd7   : > { %1427 = vmatpush1.bf16.msra.mxu0 %v1426_v7 }
  0xd8   : > { %1555 = vmatpush1.bf16.msra.mxu1 %v1554_v8  ;;  %1429 = vmatprep.subr.bf16.mxu0 %v1428_v9 }
  0xd9   : > { %1557 = vmatprep.subr.bf16.mxu1 %v1556_v12 }
  0xdb   : > { %1431 = vmatpush1.bf16.msra.mxu0 %v1430_v15 }
  0xdc   : > { %1559 = vmatpush1.bf16.msra.mxu1 %v1558_v16 }
  0xde   : > { %756 = vmatmul.mubr.f32.vlgmr.msra.gmra.mrb[0].mxu0 %v292_v17 }
  0xdf   : > { %982 = vmatmul.mubr.f32.vlgmr.msra.gmra.mrb[0].mxu1 %v292_v17  ;;  %761 = vmatprep.mubr.f32.mxu0 %v297_v18 }
  0xe0   : > { %987 = vmatprep.mubr.f32.mxu1 %v297_v18 }
  0xe2   : > { %762 = vmatmul.mubr.f32.gmra.mrb[2].mxu0 %v296_v19 }
  0xe3   : > { %988 = vmatmul.mubr.f32.gmra.mrb[2].mxu1 %v296_v19  ;;  %767 = vmatprep.mubr.f32.mxu0 %v301_v20 }
  0xe4   : > { %993 = vmatprep.mubr.f32.mxu1 %v301_v20 }
  0xe6   : > { %768 = vmatmul.mubr.f32.gmra.mrb[4].mxu0 %v300_v21 }
  0xe7   : > { %994 = vmatmul.mubr.f32.gmra.mrb[4].mxu1 %v300_v21  ;;  %773 = vmatprep.mubr.f32.mxu0 %v305_v22 }
  0xe8   : > { %999 = vmatprep.mubr.f32.mxu1 %v305_v22 }
  0xea   : > { %774 = vmatmul.mubr.f32.gmra.mrb[6].mxu0 %v304_v23 }
  0xeb   : > { %1000 = vmatmul.mubr.f32.gmra.mrb[6].mxu1 %v304_v23  ;;  %779 = vmatprep.mubr.f32.mxu0 %v309_v24 }
  0xec   : > { %1005 = vmatprep.mubr.f32.mxu1 %v309_v24 }
  0xee   : > { %780 = vmatmul.mubr.f32.gmra.mrb[8].mxu0 %v308_v25 }
  0xef   : > { %1006 = vmatmul.mubr.f32.gmra.mrb[8].mxu1 %v308_v25  ;;  %785 = vmatprep.mubr.f32.mxu0 %v313_v26 }
  0xf0   : > { %1011 = vmatprep.mubr.f32.mxu1 %v313_v26 }
  0xf2   : > { %786 = vmatmul.mubr.f32.gmra.mrb[10].mxu0 %v312_v27 }
  0xf3   : > { %1012 = vmatmul.mubr.f32.gmra.mrb[10].mxu1 %v312_v27  ;;  %791 = vmatprep.mubr.f32.mxu0 %v317_v28 }
  0xf4   : > { %1017 = vmatprep.mubr.f32.mxu1 %v317_v28 }
  0xf6   : > { %792 = vmatmul.mubr.f32.gmra.mrb[12].mxu0 %v316_v29 }
  0xf7   : > { %1018 = vmatmul.mubr.f32.gmra.mrb[12].mxu1 %v316_v29  ;;  %797 = vmatprep.mubr.f32.mxu0 %v321_v30 }
  0xf8   : > { %1023 = vmatprep.mubr.f32.mxu1 %v321_v30 }
  0xfa   : > { %798 = vmatmul.mubr.f32.gmra.mrb[14].mxu0 %v320_v31 }
  0xfb   : > { %1024 = vmatmul.mubr.f32.gmra.mrb[14].mxu1 %v320_v31 }
 0x1b1   : > { %v757_v32 = vpop.f32.mrb[0].mxu0 }
 0x1b2   : > { %1129 = vst [vmem:[%s2270_s19] sm:$0xff] %v757_v32  ;;  %v983_v33 = vpop.f32.mrb[0].mxu1  ;;  %v759_v34 = vpop.f32.mrb[1].mxu0 }
 0x1b3   : > { %1131 = vst [vmem:[%s2270_s19 + $0x10] sm:$0xff] %v983_v33  ;;  %1130 = vst [vmem:[%s2270_s19 + $0x8] sm:$0xff] %v759_v34  ;;  %v985_v35 = vpop.f32.mrb[1].mxu1 }
 0x1b4   : > { %1132 = vst [vmem:[%s2270_s19 + $0x18] sm:$0xff] %v985_v35 }
 0x1b5   : > { %v763_v36 = vpop.f32.mrb[2].mxu0 }
 0x1b6   : > { %1133 = vst [vmem:[%s2270_s19 + $0x20] sm:$0xff] %v763_v36  ;;  %v989_v37 = vpop.f32.mrb[2].mxu1  ;;  %v765_v38 = vpop.f32.mrb[3].mxu0 }
 0x1b7   : > { %1135 = vst [vmem:[%s2270_s19 + $0x30] sm:$0xff] %v989_v37  ;;  %1134 = vst [vmem:[%s2270_s19 + $0x28] sm:$0xff] %v765_v38  ;;  %v991_v39 = vpop.f32.mrb[3].mxu1 }
 0x1b8   : > { %1136 = vst [vmem:[%s2270_s19 + $0x38] sm:$0xff] %v991_v39 }
 0x1b9   : > { %v769_v40 = vpop.f32.mrb[4].mxu0 }
 0x1ba   : > { %1137 = vst [vmem:[%s2270_s19 + $0x40] sm:$0xff] %v769_v40  ;;  %v995_v41 = vpop.f32.mrb[4].mxu1  ;;  %v771_v42 = vpop.f32.mrb[5].mxu0 }
 0x1bb   : > { %1139 = vst [vmem:[%s2270_s19 + $0x50] sm:$0xff] %v995_v41  ;;  %1138 = vst [vmem:[%s2270_s19 + $0x48] sm:$0xff] %v771_v42  ;;  %v997_v43 = vpop.f32.mrb[5].mxu1 }
 0x1bc   : > { %1140 = vst [vmem:[%s2270_s19 + $0x58] sm:$0xff] %v997_v43 }
 0x1bd   : > { %v775_v44 = vpop.f32.mrb[6].mxu0 }
 0x1be   : > { %1141 = vst [vmem:[%s2270_s19 + $0x60] sm:$0xff] %v775_v44  ;;  %v1001_v45 = vpop.f32.mrb[6].mxu1  ;;  %v777_v46 = vpop.f32.mrb[7].mxu0 }
 0x1bf   : > { %1143 = vst [vmem:[%s2270_s19 + $0x70] sm:$0xff] %v1001_v45  ;;  %1142 = vst [vmem:[%s2270_s19 + $0x68] sm:$0xff] %v777_v46  ;;  %v1003_v47 = vpop.f32.mrb[7].mxu1 }
 0x1c0   : > { %1144 = vst [vmem:[%s2270_s19 + $0x78] sm:$0xff] %v1003_v47 }
 0x1c1   : > { %v781_v48 = vpop.f32.mrb[8].mxu0 }
 0x1c2   : > { %1145 = vst [vmem:[%s2270_s19 + $0x80] sm:$0xff] %v781_v48  ;;  %v1007_v49 = vpop.f32.mrb[8].mxu1  ;;  %v783_v50 = vpop.f32.mrb[9].mxu0 }
 0x1c3   : > { %1147 = vst [vmem:[%s2270_s19 + $0x90] sm:$0xff] %v1007_v49  ;;  %1146 = vst [vmem:[%s2270_s19 + $0x88] sm:$0xff] %v783_v50  ;;  %v1009_v51 = vpop.f32.mrb[9].mxu1 }
 0x1c4   : > { %1148 = vst [vmem:[%s2270_s19 + $0x98] sm:$0xff] %v1009_v51 }
 0x1c5   : > { %v787_v52 = vpop.f32.mrb[10].mxu0 }
 0x1c6   : > { %1149 = vst [vmem:[%s2270_s19 + $0xa0] sm:$0xff] %v787_v52  ;;  %v1013_v53 = vpop.f32.mrb[10].mxu1  ;;  %v789_v54 = vpop.f32.mrb[11].mxu0 }
 0x1c7   : > { %1151 = vst [vmem:[%s2270_s19 + $0xb0] sm:$0xff] %v1013_v53  ;;  %1150 = vst [vmem:[%s2270_s19 + $0xa8] sm:$0xff] %v789_v54  ;;  %v1015_v55 = vpop.f32.mrb[11].mxu1 }
 0x1c8   : > { %1152 = vst [vmem:[%s2270_s19 + $0xb8] sm:$0xff] %v1015_v55 }
 0x1c9   : > { %v793_v56 = vpop.f32.mrb[12].mxu0 }
 0x1ca   : > { %1153 = vst [vmem:[%s2270_s19 + $0xc0] sm:$0xff] %v793_v56  ;;  %v1019_v57 = vpop.f32.mrb[12].mxu1  ;;  %v795_v58 = vpop.f32.mrb[13].mxu0 }
 0x1cb   : > { %1155 = vst [vmem:[%s2270_s19 + $0xd0] sm:$0xff] %v1019_v57  ;;  %1154 = vst [vmem:[%s2270_s19 + $0xc8] sm:$0xff] %v795_v58  ;;  %v1021_v59 = vpop.f32.mrb[13].mxu1 }
 0x1cc   : > { %1156 = vst [vmem:[%s2270_s19 + $0xd8] sm:$0xff] %v1021_v59 }
 0x1cd   : > { %v799_v60 = vpop.f32.mrb[14].mxu0 }
 0x1ce   : > { %1157 = vst [vmem:[%s2270_s19 + $0xe0] sm:$0xff] %v799_v60  ;;  %v1025_v61 = vpop.f32.mrb[14].mxu1  ;;  %v801_v62 = vpop.f32.mrb[15].mxu0 }
 0x1cf   : > { %1159 = vst [vmem:[%s2270_s19 + $0xf0] sm:$0xff] %v1025_v61  ;;  %1158 = vst [vmem:[%s2270_s19 + $0xe8] sm:$0xff] %v801_v62  ;;  %v1027_v63 = vpop.f32.mrb[15].mxu1 }
 0x1d0   : > { %1160 = vst [vmem:[%s2270_s19 + $0xf8] sm:$0xff] %v1027_v63 }
 0x1d1   : > { %1742 = shalt.err (!%p1739_p8)
}
 0x1d2   : > { %s1743_s24 = scalar_lea.hbm %s2305_s6, 4096  ;;  %s1747_s26 = scalar_lea.hbm %s2362_s2, 8192 }
 0x1d3   : > { %p1744_p0 = scmp.ne.s32.totalorder %s2305_s6, %s1743_s24  ;;  %p1748_p12 = scmp.lt.u32.totalorder %s2305_s6, %s2362_s2 }
 0x1d4   : > { %p1749_p5 = scmp.lt.u32.totalorder %s1747_s26, %s1743_s24  ;;  %p1751_p9 = scmp.lt.u32.totalorder %s1743_s24, %s2305_s6 }
 0x1d5   : > { %p1745_p2 = pnand %p1744_p0, %p2381_p11 }
 0x1d6   : > { %p1750_p10 = por %p1749_p5, %p1748_p12 }
 0x1d7   : > { %p1746_p7 = pneg %p1745_p2 }
 0x1d8   : > { %p1752_p13 = por %p1751_p9, %p1750_p10 }
 0x1da   : > { %p1753_p4 = pnand %p1752_p13, %p1746_p7 }
 0x1dc   : > { %1756 = shalt.err (!%p1753_p4)
}
 0x1dd   : > { %s1823_s17 = smov 512   ;;  %s1824_s19 = smov 1024  }
 0x1de   : > { %s1825_s22 = smov 32  }
 0x1df   : > { %1598 = dma.vmem_to_hbm [thread:$0]  (%p2381_p11), %s2307_s8, 4096, %s2305_s6, %s1162_s12, %s1823_s17, %s1824_s19, %s1825_s22  }
 0x1e0 PF: > { %s1193_s15 = sand.u32 1, %s1795_s9   ;;  %p2382_p1 = scmp.ne.s32.totalorder %s2373_s21, 0 }
 0x1e1   : > { %p2383_p3 = scmp.ge.s32.totalorder %s1815_s14, 2  ;;  %s1194_s5 = scalar_lea.sflag [#allocation5], %s1193_s15 }
 0x1e3   : > { %p1609_p6 = pnand %p2383_p3, %p2382_p1 }
 0x1e5   : > { %1790 = dma.done.wait (!%p1609_p6), %s1194_s5, 4096  }
 0x1e6   : > { %1792 = vsyncadd (!%p1609_p6), %s1194_s5, 4294963200  ;;  %s19_s14 = sadd.s32 1, %s1815_s14   ;;  %s2384_s9 = smov %s1799_s10 }
 0x1e7   : > { %p16_p8 = scmp.ge.s32.totalorder %s19_s14, 4   ;;  %s2385_s10 = smov %s1803_s11 }
 0x1e8   : > { %s2386_s11 = smov %s1962_s7  ;;  %s2387_s12 = smov %s1811_s13 }
 0x1e9   : > { %s2388_s13 = smov %s2390_s27  ;;  %18 = sbr.rel (!%p16_p8) target bundleno = 7 (0x7), region = 87 }
 0x1f0   :  { %1199 = vsyncpa [#allocation4], 1 }
 0x1f1   :  { %1201 = vsyncpa [#allocation4 + $0x1], 1 }
 0x1f2   :  { %1202 = vsyncpa [#allocation7], 1 }
 0x1f3   :  { %1204 = vsyncpa [#allocation7 + $0x1], 1 }
 0x1f4   :  { %1205 = vsyncpa [#allocation5], 1 }
 0x1f5   :  { %1207 = vsyncpa [#allocation5 + $0x1], 1 }

</bundles_post_ra>
